<compile_context>
chip_gen: v5e
topology: v5e:2x2
jax: 0.10.0
libtpu: 0.0.40
codegen_flags: <defaults>
</compile_context>

<pallas_src>
import math
import functools

import jax
import jax.numpy as jnp
from jax import lax
from jax.experimental import pallas as pl
from jax.experimental.pallas import tpu as pltpu


def _gelu_exact(x):
    # torch.nn.GELU() default is the exact erf-based GELU.
    return 0.5 * x * (1.0 + lax.erf(x * (1.0 / math.sqrt(2.0))))


def mixffn_kernel(xm_ref, xt_ref, xb_ref, w1_ref, b1_ref, wc_ref, bc_ref,
                  w2_ref, b2_ref, o_ref, *, TB, TH, W, mm_dtype, gelu_approx):
    """One (batch-block, row-block) tile per grid step.

    xm_ref : (TB, TH, W, C1)  main rows of this block
    xt_ref : (TB, 1,  W, C1)  halo row above (clamped index)
    xb_ref : (TB, 1,  W, C1)  halo row below (clamped index)
    w1_ref : (C1, C2), b1_ref: (1, C2)        fc1 (w1 pre-cast to mm_dtype)
    wc_ref : (9, 1, C2), bc_ref: (1, C2)      depthwise 3x3 conv (taps on outer axis)
    w2_ref : (C2, C1), b2_ref: (1, C1)        fc2 (w2 pre-cast to mm_dtype)
    o_ref  : (TB, TH, W, C1)
    """
    j = pl.program_id(1)
    nj = pl.num_programs(1)
    C1 = w1_ref.shape[0]
    C2 = w1_ref.shape[1]

    # Hoisted single reads of all parameters.
    w1 = w1_ref[...]
    b1 = b1_ref[...]
    w2 = w2_ref[...]
    b2 = b2_ref[...]
    wc = wc_ref[...]          # (9, 1, C2)
    bc = bc_ref[...]

    # A halo row that falls outside the image must contribute exactly zero
    # (== the conv's zero padding of the fc1 output, which includes b1).
    top_gate = jnp.where(j == 0, 0.0, 1.0)
    bot_gate = jnp.where(j == nj - 1, 0.0, 1.0)

    # ---- fc1: ONE fused MXU matmul over main + halo rows ----
    # Gate the halo inputs on the cheap C1-wide side; the bias is row-gated
    # below, so gated rows end up exactly zero.
    xt = (xt_ref[...].astype(jnp.float32) * top_gate).astype(mm_dtype)
    xb = (xb_ref[...].astype(jnp.float32) * bot_gate).astype(mm_dtype)
    xm = xm_ref[...].astype(mm_dtype)
    x_ext = jnp.concatenate([xt, xm, xb], axis=1)            # (TB, TH+2, W, C1)
    h = jnp.dot(x_ext.reshape(TB * (TH + 2) * W, C1), w1,
                preferred_element_type=jnp.float32)
    h_ext = h.reshape(TB, TH + 2, W, C2)

    # Row-gated bias (tiny outer-axis concat; no full-tensor gating multiply).
    b1r = b1.reshape(1, 1, 1, C2)
    bias_ext = jnp.concatenate(
        [b1r * top_gate,
         jnp.broadcast_to(b1r, (1, TH, 1, C2)),
         b1r * bot_gate], axis=1)                             # (1, TH+2, 1, C2)
    h_ext = h_ext + bias_ext

    # ---- 3x3 depthwise conv, padding=1 ----
    # Column shifts via XLU rolls along the W (sublane) axis with the wrapped
    # column zeroed (== left/right zero padding); row taps are cheap static
    # slices along the outer row axis.  Accumulation stays f32 (v5e-safe).
    col_idx = lax.broadcasted_iota(jnp.int32, (1, W, 1), 1)
    not_first = (col_idx > 0).astype(jnp.float32)             # zero col 0
    not_last = (col_idx < W - 1).astype(jnp.float32)          # zero col W-1
    h3 = h_ext.reshape(TB * (TH + 2), W, C2)

    acc = jnp.broadcast_to(bc.reshape(1, 1, 1, C2), (TB, TH, W, C2))
    for dw in range(3):                       # dw-outer: one shifted copy live
        if dw == 0:
            hs = (pltpu.roll(h3, shift=1, axis=1) * not_first
                  ).reshape(TB, TH + 2, W, C2)                # col x <- col x-1
        elif dw == 1:
            hs = h_ext
        else:
            hs = (pltpu.roll(h3, shift=W - 1, axis=1) * not_last
                  ).reshape(TB, TH + 2, W, C2)                # col x <- col x+1
        for dh in range(3):
            tap = wc[3 * dh + dw].reshape(1, 1, 1, C2)
            acc = acc + hs[:, dh:dh + TH] * tap

    # ---- GELU ----
    if gelu_approx:
        a = jax.nn.gelu(acc, approximate=True)   # tanh -> EUP slot
    else:
        a = _gelu_exact(acc)                     # matches nn.GELU() default

    # ---- fc2 (MXU, f32 accumulate) ----
    a2 = a.reshape(TB * TH * W, C2).astype(mm_dtype)
    out = jnp.dot(a2, w2, preferred_element_type=jnp.float32) + b2
    o_ref[...] = out.reshape(TB, TH, W, C1).astype(o_ref.dtype)


# ----------------------------- tiling policy -----------------------------

def _rup(n, m):
    return ((n + m - 1) // m) * m


def _vmem_capacity_bytes():
    try:
        return int(pltpu.get_tpu_info().vmem_capacity_bytes)
    except Exception:
        return 64 * 1024 * 1024   # conservative fallback (v7x has the smallest VMEM)


def _vmem_estimate_bytes(TB, TH, W, C1, C2, x_isz, mm_isz):
    """Per-step VMEM footprint with (8,128) lane/sublane padding made explicit."""
    c1p, c2p, wp = _rup(C1, 128), _rup(C2, 128), _rup(W, 8)
    rows_ext = TB * (TH + 2)
    rows = TB * TH
    # Double-buffered HBM<->VMEM blocks: input main + 2 halo rows + output.
    io = 2 * (2 * rows * wp * c1p * x_isz + 2 * TB * wp * c1p * x_isz)
    # Double-buffered parameters (w1/w2 in matmul dtype, rest f32).
    params = 2 * (_rup(C1, 8) * c2p * mm_isz + _rup(C2, 8) * c1p * mm_isz
                  + (9 * 8 * c2p + 2 * 8 * c2p + 8 * c1p) * 4)
    # Major in-kernel intermediates: x_ext, h_ext + 2 rolled copies (+ slack),
    # acc + gelu, fc2-input cast, fc2 output + store cast.
    interm = (rows_ext * wp * c1p * 4
              + 4 * rows_ext * wp * c2p * 4
              + 2 * rows * wp * c2p * 4
              + rows * wp * c2p * mm_isz
              + 2 * rows * wp * c1p * 4)
    return io + params + interm


def _divisors(n):
    return [d for d in range(1, n + 1) if n % d == 0]


def _choose_tiles(B, H, W, C1, C2, x_isz, mm_isz, budget,
                  fixed_tb=None, fixed_th=None):
    tb_opts = [fixed_tb] if fixed_tb is not None else _divisors(B)
    th_opts = [fixed_th] if fixed_th is not None else _divisors(H)
    best, best_score = None, None
    for tb in tb_opts:
        for th in th_opts:
            if _vmem_estimate_bytes(tb, th, W, C1, C2, x_isz, mm_isz) > budget:
                continue
            m = tb * th * W                       # fc1/fc2 rows per step
            grid = (B // tb) * (H // th)
            score = (
                1 if grid >= 2 else 0,                              # keep v7x's 2 TCs busy
                2 if m % 256 == 0 else (1 if m % 128 == 0 else 0),  # MXU-aligned M
                min(m, 2048),                                       # amortize step overhead
                th,                                                 # less halo recompute
            )
            if best_score is None or score > best_score:
                best, best_score = (tb, th), score
    if best is None:
        best = (fixed_tb if fixed_tb is not None else 1,
                fixed_th if fixed_th is not None else 1)
    return best


# ------------------------------- wrapper ---------------------------------

def mixffn_pallas(x, w1, b1, wc, bc, w2, b2, H, W, *,
                  rows_per_block=None, batch_per_block=None,
                  matmul_dtype=None, gelu_approximate=False):
    B, N, C1 = x.shape
    C2 = w1.shape[1]
    assert N == H * W
    if matmul_dtype is None:
        matmul_dtype = jnp.bfloat16 if x.dtype == jnp.bfloat16 else jnp.float32
    x_isz = jnp.dtype(x.dtype).itemsize
    mm_isz = jnp.dtype(matmul_dtype).itemsize

    cap = _vmem_capacity_bytes()          # 64 MiB (v7x) / 128 MiB (v5e, v6e)
    budget = int(cap * 0.45)              # tile-selection budget with headroom

    TB, TH = batch_per_block, rows_per_block
    if TB is None or TH is None:
        TB, TH = _choose_tiles(B, H, W, C1, C2, x_isz, mm_isz, budget,
                               fixed_tb=batch_per_block, fixed_th=rows_per_block)
    assert H % TH == 0, f"rows_per_block={TH} must divide H={H}"
    assert B % TB == 0, f"batch_per_block={TB} must divide B={B}"
    G, R = B // TB, H // TH

    x4 = x.reshape(B, H, W, C1)  # NHWC; channels on lanes inside the kernel

    # One-time wrapper-side casts: matmul weights in mm dtype, the rest f32.
    w1c = w1.astype(matmul_dtype)
    w2c = w2.astype(matmul_dtype)
    b1f = b1.astype(jnp.float32)
    b2f = b2.astype(jnp.float32)
    wc9 = wc.reshape(9, 1, C2).astype(jnp.float32)   # taps on the outer axis
    bcf = bc.astype(jnp.float32)

    est = _vmem_estimate_bytes(TB, TH, W, C1, C2, x_isz, mm_isz)
    vmem_limit = int(min(max(2 * est, 32 * 1024 * 1024), int(cap * 0.75)))

    kernel = functools.partial(mixffn_kernel, TB=TB, TH=TH, W=W,
                               mm_dtype=matmul_dtype,
                               gelu_approx=gelu_approximate)
    const2 = lambda b, j: (0, 0)
    const3 = lambda b, j: (0, 0, 0)

    out4 = pl.pallas_call(
        kernel,
        out_shape=jax.ShapeDtypeStruct((B, H, W, C1), x.dtype),
        grid_spec=pltpu.PrefetchScalarGridSpec(
            num_scalar_prefetch=0,
            grid=(G, R),
            in_specs=[
                # main rows of this block
                pl.BlockSpec((TB, TH, W, C1), lambda b, j: (b, j, 0, 0)),
                # halo row above (clamped; zero-gated in-kernel at j == 0)
                pl.BlockSpec((TB, 1, W, C1),
                             lambda b, j: (b, jnp.maximum(j * TH - 1, 0), 0, 0)),
                # halo row below (clamped; zero-gated in-kernel at j == R-1)
                pl.BlockSpec((TB, 1, W, C1),
                             lambda b, j: (b, jnp.minimum((j + 1) * TH, H - 1), 0, 0)),
                pl.BlockSpec((C1, C2), const2),     # fc1 weight (constant index)
                pl.BlockSpec((1, C2), const2),      # fc1 bias
                pl.BlockSpec((9, 1, C2), const3),   # dwconv weight (flattened taps)
                pl.BlockSpec((1, C2), const2),      # dwconv bias
                pl.BlockSpec((C2, C1), const2),     # fc2 weight
                pl.BlockSpec((1, C1), const2),      # fc2 bias
            ],
            out_specs=pl.BlockSpec((TB, TH, W, C1), lambda b, j: (b, j, 0, 0)),
        ),
        compiler_params=pltpu.CompilerParams(
            dimension_semantics=("parallel", "parallel"),
            vmem_limit_bytes=vmem_limit),
    )(x4, x4, x4, w1c, b1f, wc9, bcf, w2c, b2f)

    return out4.reshape(B, N, C1)


def mixffn_ref(x, w1, b1, wc, bc, w2, b2, H, W):
    """Pure-JAX reference matching the PyTorch MixFFN forward."""
    B, N, C1 = x.shape
    C2 = w1.shape[1]
    h = x @ w1 + b1                                   # (B, N, C2)
    h_hw = h.reshape(B, H, W, C2)                     # NHWC
    kern = wc.reshape(3, 3, 1, C2)                    # HWIO depthwise kernel
    conv = lax.conv_general_dilated(
        h_hw, kern, window_strides=(1, 1), padding="SAME",
        dimension_numbers=("NHWC", "HWIO", "NHWC"),
        feature_group_count=C2)
    a = _gelu_exact(conv + bc)
    return a.reshape(B, N, C2) @ w2 + b2


if __name__ == "__main__":
    # Small shapes consistent with MixFFN(in_dim, 4*in_dim) on (B, H*W, in_dim).
    B, H, W = 2, 16, 16
    C1 = 8
    C2 = 4 * C1
    N = H * W

    key = jax.random.PRNGKey(0)
    kx, k1, kb1, kc, kbc, k2, kb2 = jax.random.split(key, 7)

    x = jax.random.normal(kx, (B, N, C1), jnp.float32)

    lim1 = 1.0 / math.sqrt(C1)
    w1 = jax.random.uniform(k1, (C1, C2), jnp.float32, -lim1, lim1)
    b1 = jax.random.uniform(kb1, (1, C2), jnp.float32, -lim1, lim1)

    limc = 1.0 / 3.0   # depthwise conv: fan_in = 1 * 3 * 3
    wc = jax.random.uniform(kc, (3, 3, C2), jnp.float32, -limc, limc)
    bc = jax.random.uniform(kbc, (1, C2), jnp.float32, -limc, limc)

    lim2 = 1.0 / math.sqrt(C2)
    w2 = jax.random.uniform(k2, (C2, C1), jnp.float32, -lim2, lim2)
    b2 = jax.random.uniform(kb2, (1, C1), jnp.float32, -lim2, lim2)

    ref = mixffn_ref(x, w1, b1, wc, bc, w2, b2, H, W)

    # 1) f32 matmuls, explicit 4-row tiles, TB=1 -> exercises the halo path.
    out = jax.block_until_ready(
        mixffn_pallas(x, w1, b1, wc, bc, w2, b2, H, W,
                      rows_per_block=4, batch_per_block=1))
    assert out.shape == (B, N, C1)
    assert jnp.allclose(out, ref, rtol=1e-5, atol=1e-4), (
        float(jnp.max(jnp.abs(out - ref))))

    # 2) f32, auto-chosen (TB, TH) -> single row-block edge case (gates both 0).
    out2 = jax.block_until_ready(
        mixffn_pallas(x, w1, b1, wc, bc, w2, b2, H, W))
    assert jnp.allclose(out2, ref, rtol=1e-5, atol=1e-4), (
        float(jnp.max(jnp.abs(out2 - ref))))

    # 3) bf16 MXU operands + batch-tiled (TB=2) blocks; conv/GELU and
    #    accumulation stay f32.
    out3 = jax.block_until_ready(
        mixffn_pallas(x, w1, b1, wc, bc, w2, b2, H, W,
                      rows_per_block=8, batch_per_block=2,
                      matmul_dtype=jnp.bfloat16))
    assert jnp.allclose(out3, ref, rtol=1e-1, atol=1e-1), (
        float(jnp.max(jnp.abs(out3 - ref))))

    # 4) tanh-approximate GELU (EUP path) — optional fidelity tradeoff.
    out4 = jax.block_until_ready(
        mixffn_pallas(x, w1, b1, wc, bc, w2, b2, H, W, gelu_approximate=True))
    assert jnp.allclose(out4, ref, rtol=5e-2, atol=5e-2), (
        float(jnp.max(jnp.abs(out4 - ref))))

    print("KERNEL_OK")
</pallas_src>

<mosaic_0001>
module attributes {stable_mosaic.version = 11 : i64} {
  func.func @mixffn_kernel(%arg0: i32, %arg1: i32, %arg2: memref<1x4x16x8xf32, #tpu.memory_space<vmem>>, %arg3: memref<1x1x16x8xf32, #tpu.memory_space<vmem>>, %arg4: memref<1x1x16x8xf32, #tpu.memory_space<vmem>>, %arg5: memref<8x32xf32, #tpu.memory_space<vmem>>, %arg6: memref<1x32xf32, #tpu.memory_space<vmem>>, %arg7: memref<9x1x32xf32, #tpu.memory_space<vmem>>, %arg8: memref<1x32xf32, #tpu.memory_space<vmem>>, %arg9: memref<32x8xf32, #tpu.memory_space<vmem>>, %arg10: memref<1x8xf32, #tpu.memory_space<vmem>>, %arg11: memref<1x4x16x8xf32, #tpu.memory_space<vmem>>) attributes {dimension_semantics = [#tpu.dimension_semantics<parallel>, #tpu.dimension_semantics<parallel>], iteration_bounds = array<i64: 2, 4>, scalar_prefetch = 0 : i64, scratch_operands = 0 : i64, tpu.core_type = #tpu.core_type<tc>, window_params = [{transform_indices = @transform_0, window_bounds = array<i64: 1, 4, 16, 8>}, {transform_indices = @transform_1, window_bounds = array<i64: 1, 1, 16, 8>}, {transform_indices = @transform_2, window_bounds = array<i64: 1, 1, 16, 8>}, {pipeline_mode = #tpu.pipeline_mode<synchronous>, transform_indices = @transform_3, window_bounds = array<i64: 8, 32>}, {pipeline_mode = #tpu.pipeline_mode<synchronous>, transform_indices = @transform_4, window_bounds = array<i64: 1, 32>}, {pipeline_mode = #tpu.pipeline_mode<synchronous>, transform_indices = @transform_5, window_bounds = array<i64: 9, 1, 32>}, {pipeline_mode = #tpu.pipeline_mode<synchronous>, transform_indices = @transform_6, window_bounds = array<i64: 1, 32>}, {pipeline_mode = #tpu.pipeline_mode<synchronous>, transform_indices = @transform_7, window_bounds = array<i64: 32, 8>}, {pipeline_mode = #tpu.pipeline_mode<synchronous>, transform_indices = @transform_8, window_bounds = array<i64: 1, 8>}, {transform_indices = @transform_9, window_bounds = array<i64: 1, 4, 16, 8>}]} {
    %c0 = arith.constant 0 : index
    %c0_0 = arith.constant 0 : index
    %0 = vector.load %arg5[%c0, %c0_0] : memref<8x32xf32, #tpu.memory_space<vmem>>, vector<8x32xf32>
    %c0_1 = arith.constant 0 : index
    %c0_2 = arith.constant 0 : index
    %1 = vector.load %arg6[%c0_1, %c0_2] : memref<1x32xf32, #tpu.memory_space<vmem>>, vector<1x32xf32>
    %c0_3 = arith.constant 0 : index
    %c0_4 = arith.constant 0 : index
    %2 = vector.load %arg9[%c0_3, %c0_4] : memref<32x8xf32, #tpu.memory_space<vmem>>, vector<32x8xf32>
    %c0_5 = arith.constant 0 : index
    %c0_6 = arith.constant 0 : index
    %3 = vector.load %arg10[%c0_5, %c0_6] : memref<1x8xf32, #tpu.memory_space<vmem>>, vector<1x8xf32>
    %c0_7 = arith.constant 0 : index
    %c0_8 = arith.constant 0 : index
    %c0_9 = arith.constant 0 : index
    %4 = vector.load %arg7[%c0_7, %c0_8, %c0_9] : memref<9x1x32xf32, #tpu.memory_space<vmem>>, vector<9x1x32xf32>
    %c0_10 = arith.constant 0 : index
    %c0_11 = arith.constant 0 : index
    %5 = vector.load %arg8[%c0_10, %c0_11] : memref<1x32xf32, #tpu.memory_space<vmem>>, vector<1x32xf32>
    %c0_i32 = arith.constant 0 : i32
    %6 = arith.cmpi eq, %arg1, %c0_i32 : i32
    %cst = arith.constant 0.000000e+00 : f32
    %cst_12 = arith.constant 1.000000e+00 : f32
    %7 = arith.select %6, %cst, %cst_12 : f32
    %c3_i32 = arith.constant 3 : i32
    %8 = arith.cmpi eq, %arg1, %c3_i32 : i32
    %cst_13 = arith.constant 0.000000e+00 : f32
    %cst_14 = arith.constant 1.000000e+00 : f32
    %9 = arith.select %8, %cst_13, %cst_14 : f32
    %c0_15 = arith.constant 0 : index
    %c0_16 = arith.constant 0 : index
    %c0_17 = arith.constant 0 : index
    %c0_18 = arith.constant 0 : index
    %10 = vector.load %arg3[%c0_15, %c0_16, %c0_17, %c0_18] : memref<1x1x16x8xf32, #tpu.memory_space<vmem>>, vector<1x1x16x8xf32>
    %11 = vector.broadcast %7 : f32 to vector<1x1x16x8xf32>
    %12 = arith.mulf %10, %11 : vector<1x1x16x8xf32>
    %c0_19 = arith.constant 0 : index
    %c0_20 = arith.constant 0 : index
    %c0_21 = arith.constant 0 : index
    %c0_22 = arith.constant 0 : index
    %13 = vector.load %arg4[%c0_19, %c0_20, %c0_21, %c0_22] : memref<1x1x16x8xf32, #tpu.memory_space<vmem>>, vector<1x1x16x8xf32>
    %14 = vector.broadcast %9 : f32 to vector<1x1x16x8xf32>
    %15 = arith.mulf %13, %14 : vector<1x1x16x8xf32>
    %c0_23 = arith.constant 0 : index
    %c0_24 = arith.constant 0 : index
    %c0_25 = arith.constant 0 : index
    %c0_26 = arith.constant 0 : index
    %16 = vector.load %arg2[%c0_23, %c0_24, %c0_25, %c0_26] : memref<1x4x16x8xf32, #tpu.memory_space<vmem>>, vector<1x4x16x8xf32>
    %17 = tpu.concatenate %12, %16, %15 in 1 : vector<1x1x16x8xf32>, vector<1x4x16x8xf32>, vector<1x1x16x8xf32> -> vector<1x6x16x8xf32>
    %18 = vector.shape_cast %17 : vector<1x6x16x8xf32> to vector<96x8xf32>
    %cst_27 = arith.constant dense<0.000000e+00> : vector<96x32xf32>
    %19 = tpu.matmul %18, %0, %cst_27 {dimension_numbers = #tpu.dot_dimension_numbers<[1], [0], [0], [1], [0, 0, 1, 1], [], []>} : vector<96x8xf32>, vector<8x32xf32>, vector<96x32xf32> -> vector<96x32xf32>
    %20 = vector.shape_cast %19 : vector<96x32xf32> to vector<1x6x16x32xf32>
    %21 = vector.shape_cast %1 : vector<1x32xf32> to vector<1x1x1x32xf32>
    %22 = vector.broadcast %7 : f32 to vector<1x1x1x32xf32>
    %23 = arith.mulf %21, %22 : vector<1x1x1x32xf32>
    %24 = vector.shape_cast %21 : vector<1x1x1x32xf32> to vector<1x1x1x32xf32>
    %25 = vector.broadcast %24 : vector<1x1x1x32xf32> to vector<1x4x1x32xf32>
    %26 = vector.broadcast %9 : f32 to vector<1x1x1x32xf32>
    %27 = arith.mulf %21, %26 : vector<1x1x1x32xf32>
    %28 = tpu.concatenate %23, %25, %27 in 1 : vector<1x1x1x32xf32>, vector<1x4x1x32xf32>, vector<1x1x1x32xf32> -> vector<1x6x1x32xf32>
    %29 = vector.broadcast %28 : vector<1x6x1x32xf32> to vector<1x6x16x32xf32>
    %30 = arith.addf %20, %29 : vector<1x6x16x32xf32>
    %31 = tpu.iota {dimensions = array<i32: 1>} : vector<1x16x1xi32>
    %c0_i32_28 = arith.constant 0 : i32
    %32 = vector.broadcast %c0_i32_28 : i32 to vector<1x16x1xi32>
    %33 = arith.cmpi sgt, %31, %32 : vector<1x16x1xi32>
    %34 = arith.extui %33 : vector<1x16x1xi1> to vector<1x16x1xi32>
    %35 = arith.sitofp %34 : vector<1x16x1xi32> to vector<1x16x1xf32>
    %c15_i32 = arith.constant 15 : i32
    %36 = vector.broadcast %c15_i32 : i32 to vector<1x16x1xi32>
    %37 = arith.cmpi slt, %31, %36 : vector<1x16x1xi32>
    %38 = arith.extui %37 : vector<1x16x1xi1> to vector<1x16x1xi32>
    %39 = arith.sitofp %38 : vector<1x16x1xi32> to vector<1x16x1xf32>
    %40 = vector.shape_cast %30 : vector<1x6x16x32xf32> to vector<6x16x32xf32>
    %41 = vector.shape_cast %5 : vector<1x32xf32> to vector<1x1x1x32xf32>
    %42 = vector.shape_cast %41 : vector<1x1x1x32xf32> to vector<1x1x1x32xf32>
    %43 = vector.broadcast %42 : vector<1x1x1x32xf32> to vector<1x4x16x32xf32>
    %c1_i32 = arith.constant 1 : i32
    %44 = tpu.dynamic_rotate %40 by %c1_i32 dim 1 : vector<6x16x32xf32>, i32 -> vector<6x16x32xf32>
    %45 = vector.broadcast %35 : vector<1x16x1xf32> to vector<6x16x32xf32>
    %46 = arith.mulf %44, %45 : vector<6x16x32xf32>
    %47 = vector.shape_cast %46 : vector<6x16x32xf32> to vector<1x6x16x32xf32>
    %48 = vector.extract_strided_slice %4 {offsets = [0, 0, 0], sizes = [1, 1, 32], strides = [1, 1, 1]} : vector<9x1x32xf32> to vector<1x1x32xf32>
    %49 = vector.shape_cast %48 : vector<1x1x32xf32> to vector<1x32xf32>
    %50 = vector.shape_cast %49 : vector<1x32xf32> to vector<1x1x1x32xf32>
    %51 = vector.extract_strided_slice %47 {offsets = [0, 0, 0, 0], sizes = [1, 4, 16, 32], strides = [1, 1, 1, 1]} : vector<1x6x16x32xf32> to vector<1x4x16x32xf32>
    %52 = vector.broadcast %50 : vector<1x1x1x32xf32> to vector<1x4x16x32xf32>
    %53 = arith.mulf %51, %52 : vector<1x4x16x32xf32>
    %54 = arith.addf %43, %53 : vector<1x4x16x32xf32>
    %55 = vector.extract_strided_slice %4 {offsets = [3, 0, 0], sizes = [1, 1, 32], strides = [1, 1, 1]} : vector<9x1x32xf32> to vector<1x1x32xf32>
    %56 = vector.shape_cast %55 : vector<1x1x32xf32> to vector<1x32xf32>
    %57 = vector.shape_cast %56 : vector<1x32xf32> to vector<1x1x1x32xf32>
    %58 = vector.extract_strided_slice %47 {offsets = [0, 1, 0, 0], sizes = [1, 4, 16, 32], strides = [1, 1, 1, 1]} : vector<1x6x16x32xf32> to vector<1x4x16x32xf32>
    %59 = vector.broadcast %57 : vector<1x1x1x32xf32> to vector<1x4x16x32xf32>
    %60 = arith.mulf %58, %59 : vector<1x4x16x32xf32>
    %61 = arith.addf %54, %60 : vector<1x4x16x32xf32>
    %62 = vector.extract_strided_slice %4 {offsets = [6, 0, 0], sizes = [1, 1, 32], strides = [1, 1, 1]} : vector<9x1x32xf32> to vector<1x1x32xf32>
    %63 = vector.shape_cast %62 : vector<1x1x32xf32> to vector<1x32xf32>
    %64 = vector.shape_cast %63 : vector<1x32xf32> to vector<1x1x1x32xf32>
    %65 = vector.extract_strided_slice %47 {offsets = [0, 2, 0, 0], sizes = [1, 4, 16, 32], strides = [1, 1, 1, 1]} : vector<1x6x16x32xf32> to vector<1x4x16x32xf32>
    %66 = vector.broadcast %64 : vector<1x1x1x32xf32> to vector<1x4x16x32xf32>
    %67 = arith.mulf %65, %66 : vector<1x4x16x32xf32>
    %68 = arith.addf %61, %67 : vector<1x4x16x32xf32>
    %69 = vector.extract_strided_slice %4 {offsets = [1, 0, 0], sizes = [1, 1, 32], strides = [1, 1, 1]} : vector<9x1x32xf32> to vector<1x1x32xf32>
    %70 = vector.shape_cast %69 : vector<1x1x32xf32> to vector<1x32xf32>
    %71 = vector.shape_cast %70 : vector<1x32xf32> to vector<1x1x1x32xf32>
    %72 = vector.extract_strided_slice %30 {offsets = [0, 0, 0, 0], sizes = [1, 4, 16, 32], strides = [1, 1, 1, 1]} : vector<1x6x16x32xf32> to vector<1x4x16x32xf32>
    %73 = vector.broadcast %71 : vector<1x1x1x32xf32> to vector<1x4x16x32xf32>
    %74 = arith.mulf %72, %73 : vector<1x4x16x32xf32>
    %75 = arith.addf %68, %74 : vector<1x4x16x32xf32>
    %76 = vector.extract_strided_slice %4 {offsets = [4, 0, 0], sizes = [1, 1, 32], strides = [1, 1, 1]} : vector<9x1x32xf32> to vector<1x1x32xf32>
    %77 = vector.shape_cast %76 : vector<1x1x32xf32> to vector<1x32xf32>
    %78 = vector.shape_cast %77 : vector<1x32xf32> to vector<1x1x1x32xf32>
    %79 = vector.extract_strided_slice %30 {offsets = [0, 1, 0, 0], sizes = [1, 4, 16, 32], strides = [1, 1, 1, 1]} : vector<1x6x16x32xf32> to vector<1x4x16x32xf32>
    %80 = vector.broadcast %78 : vector<1x1x1x32xf32> to vector<1x4x16x32xf32>
    %81 = arith.mulf %79, %80 : vector<1x4x16x32xf32>
    %82 = arith.addf %75, %81 : vector<1x4x16x32xf32>
    %83 = vector.extract_strided_slice %4 {offsets = [7, 0, 0], sizes = [1, 1, 32], strides = [1, 1, 1]} : vector<9x1x32xf32> to vector<1x1x32xf32>
    %84 = vector.shape_cast %83 : vector<1x1x32xf32> to vector<1x32xf32>
    %85 = vector.shape_cast %84 : vector<1x32xf32> to vector<1x1x1x32xf32>
    %86 = vector.extract_strided_slice %30 {offsets = [0, 2, 0, 0], sizes = [1, 4, 16, 32], strides = [1, 1, 1, 1]} : vector<1x6x16x32xf32> to vector<1x4x16x32xf32>
    %87 = vector.broadcast %85 : vector<1x1x1x32xf32> to vector<1x4x16x32xf32>
    %88 = arith.mulf %86, %87 : vector<1x4x16x32xf32>
    %89 = arith.addf %82, %88 : vector<1x4x16x32xf32>
    %c15_i32_29 = arith.constant 15 : i32
    %90 = tpu.dynamic_rotate %40 by %c15_i32_29 dim 1 : vector<6x16x32xf32>, i32 -> vector<6x16x32xf32>
    %91 = vector.broadcast %39 : vector<1x16x1xf32> to vector<6x16x32xf32>
    %92 = arith.mulf %90, %91 : vector<6x16x32xf32>
    %93 = vector.shape_cast %92 : vector<6x16x32xf32> to vector<1x6x16x32xf32>
    %94 = vector.extract_strided_slice %4 {offsets = [2, 0, 0], sizes = [1, 1, 32], strides = [1, 1, 1]} : vector<9x1x32xf32> to vector<1x1x32xf32>
    %95 = vector.shape_cast %94 : vector<1x1x32xf32> to vector<1x32xf32>
    %96 = vector.shape_cast %95 : vector<1x32xf32> to vector<1x1x1x32xf32>
    %97 = vector.extract_strided_slice %93 {offsets = [0, 0, 0, 0], sizes = [1, 4, 16, 32], strides = [1, 1, 1, 1]} : vector<1x6x16x32xf32> to vector<1x4x16x32xf32>
    %98 = vector.broadcast %96 : vector<1x1x1x32xf32> to vector<1x4x16x32xf32>
    %99 = arith.mulf %97, %98 : vector<1x4x16x32xf32>
    %100 = arith.addf %89, %99 : vector<1x4x16x32xf32>
    %101 = vector.extract_strided_slice %4 {offsets = [5, 0, 0], sizes = [1, 1, 32], strides = [1, 1, 1]} : vector<9x1x32xf32> to vector<1x1x32xf32>
    %102 = vector.shape_cast %101 : vector<1x1x32xf32> to vector<1x32xf32>
    %103 = vector.shape_cast %102 : vector<1x32xf32> to vector<1x1x1x32xf32>
    %104 = vector.extract_strided_slice %93 {offsets = [0, 1, 0, 0], sizes = [1, 4, 16, 32], strides = [1, 1, 1, 1]} : vector<1x6x16x32xf32> to vector<1x4x16x32xf32>
    %105 = vector.broadcast %103 : vector<1x1x1x32xf32> to vector<1x4x16x32xf32>
    %106 = arith.mulf %104, %105 : vector<1x4x16x32xf32>
    %107 = arith.addf %100, %106 : vector<1x4x16x32xf32>
    %108 = vector.extract_strided_slice %4 {offsets = [8, 0, 0], sizes = [1, 1, 32], strides = [1, 1, 1]} : vector<9x1x32xf32> to vector<1x1x32xf32>
    %109 = vector.shape_cast %108 : vector<1x1x32xf32> to vector<1x32xf32>
    %110 = vector.shape_cast %109 : vector<1x32xf32> to vector<1x1x1x32xf32>
    %111 = vector.extract_strided_slice %93 {offsets = [0, 2, 0, 0], sizes = [1, 4, 16, 32], strides = [1, 1, 1, 1]} : vector<1x6x16x32xf32> to vector<1x4x16x32xf32>
    %112 = vector.broadcast %110 : vector<1x1x1x32xf32> to vector<1x4x16x32xf32>
    %113 = arith.mulf %111, %112 : vector<1x4x16x32xf32>
    %114 = arith.addf %107, %113 : vector<1x4x16x32xf32>
    %cst_30 = arith.constant 5.000000e-01 : f32
    %115 = vector.broadcast %cst_30 : f32 to vector<1x4x16x32xf32>
    %116 = arith.mulf %115, %114 : vector<1x4x16x32xf32>
    %cst_31 = arith.constant 0.707106769 : f32
    %117 = vector.broadcast %cst_31 : f32 to vector<1x4x16x32xf32>
    %118 = arith.mulf %114, %117 : vector<1x4x16x32xf32>
    %119 = math.erf %118 : vector<1x4x16x32xf32>
    %cst_32 = arith.constant 1.000000e+00 : f32
    %120 = vector.broadcast %cst_32 : f32 to vector<1x4x16x32xf32>
    %121 = arith.addf %120, %119 : vector<1x4x16x32xf32>
    %122 = arith.mulf %116, %121 : vector<1x4x16x32xf32>
    %123 = vector.shape_cast %122 : vector<1x4x16x32xf32> to vector<64x32xf32>
    %cst_33 = arith.constant dense<0.000000e+00> : vector<64x8xf32>
    %124 = tpu.matmul %123, %2, %cst_33 {dimension_numbers = #tpu.dot_dimension_numbers<[1], [0], [0], [1], [0, 0, 1, 1], [], []>} : vector<64x32xf32>, vector<32x8xf32>, vector<64x8xf32> -> vector<64x8xf32>
    %125 = vector.broadcast %3 : vector<1x8xf32> to vector<64x8xf32>
    %126 = arith.addf %124, %125 : vector<64x8xf32>
    %127 = vector.shape_cast %126 : vector<64x8xf32> to vector<1x4x16x8xf32>
    %c0_34 = arith.constant 0 : index
    %c0_35 = arith.constant 0 : index
    %c0_36 = arith.constant 0 : index
    %c0_37 = arith.constant 0 : index
    %128 = vector.load %arg11[%c0_34, %c0_35, %c0_36, %c0_37] : memref<1x4x16x8xf32, #tpu.memory_space<vmem>>, vector<1x4x16x8xf32>
    tpu.vector_store %arg11[%c0_34, %c0_35, %c0_36, %c0_37], %127 {strides = array<i32>} : memref<1x4x16x8xf32, #tpu.memory_space<vmem>>, vector<1x4x16x8xf32>,
    return
  }
  func.func @transform_0(%arg0: i32, %arg1: i32) -> (i32, i32, i32, i32) {
    %c0_i32 = arith.constant 0 : i32
    %c0_i32_0 = arith.constant 0 : i32
    %c0_i32_1 = arith.constant 0 : i32
    return %arg0, %arg1, %c0_i32, %c0_i32_0 : i32, i32, i32, i32
  }
  func.func @transform_1(%arg0: i32, %arg1: i32) -> (i32, i32, i32, i32) {
    %c4_i32 = arith.constant 4 : i32
    %0 = arith.muli %arg1, %c4_i32 : i32
    %c1_i32 = arith.constant 1 : i32
    %1 = arith.subi %0, %c1_i32 : i32
    %c0_i32 = arith.constant 0 : i32
    %2 = arith.maxsi %1, %c0_i32 : i32
    %c0_i32_0 = arith.constant 0 : i32
    %c0_i32_1 = arith.constant 0 : i32
    %c0_i32_2 = arith.constant 0 : i32
    return %arg0, %2, %c0_i32_0, %c0_i32_1 : i32, i32, i32, i32
  }
  func.func @transform_2(%arg0: i32, %arg1: i32) -> (i32, i32, i32, i32) {
    %c1_i32 = arith.constant 1 : i32
    %0 = arith.addi %arg1, %c1_i32 : i32
    %c4_i32 = arith.constant 4 : i32
    %1 = arith.muli %0, %c4_i32 : i32
    %c15_i32 = arith.constant 15 : i32
    %2 = arith.minsi %1, %c15_i32 : i32
    %c0_i32 = arith.constant 0 : i32
    %c0_i32_0 = arith.constant 0 : i32
    %c0_i32_1 = arith.constant 0 : i32
    return %arg0, %2, %c0_i32, %c0_i32_0 : i32, i32, i32, i32
  }
  func.func @transform_3(%arg0: i32, %arg1: i32) -> (i32, i32) {
    %c0_i32 = arith.constant 0 : i32
    %c0_i32_0 = arith.constant 0 : i32
    %c0_i32_1 = arith.constant 0 : i32
    return %c0_i32, %c0_i32_0 : i32, i32
  }
  func.func @transform_4(%arg0: i32, %arg1: i32) -> (i32, i32) {
    %c0_i32 = arith.constant 0 : i32
    %c0_i32_0 = arith.constant 0 : i32
    %c0_i32_1 = arith.constant 0 : i32
    return %c0_i32, %c0_i32_0 : i32, i32
  }
  func.func @transform_5(%arg0: i32, %arg1: i32) -> (i32, i32, i32) {
    %c0_i32 = arith.constant 0 : i32
    %c0_i32_0 = arith.constant 0 : i32
    %c0_i32_1 = arith.constant 0 : i32
    %c0_i32_2 = arith.constant 0 : i32
    return %c0_i32, %c0_i32_0, %c0_i32_1 : i32, i32, i32
  }
  func.func @transform_6(%arg0: i32, %arg1: i32) -> (i32, i32) {
    %c0_i32 = arith.constant 0 : i32
    %c0_i32_0 = arith.constant 0 : i32
    %c0_i32_1 = arith.constant 0 : i32
    return %c0_i32, %c0_i32_0 : i32, i32
  }
  func.func @transform_7(%arg0: i32, %arg1: i32) -> (i32, i32) {
    %c0_i32 = arith.constant 0 : i32
    %c0_i32_0 = arith.constant 0 : i32
    %c0_i32_1 = arith.constant 0 : i32
    return %c0_i32, %c0_i32_0 : i32, i32
  }
  func.func @transform_8(%arg0: i32, %arg1: i32) -> (i32, i32) {
    %c0_i32 = arith.constant 0 : i32
    %c0_i32_0 = arith.constant 0 : i32
    %c0_i32_1 = arith.constant 0 : i32
    return %c0_i32, %c0_i32_0 : i32, i32
  }
  func.func @transform_9(%arg0: i32, %arg1: i32) -> (i32, i32, i32, i32) {
    %c0_i32 = arith.constant 0 : i32
    %c0_i32_0 = arith.constant 0 : i32
    %c0_i32_1 = arith.constant 0 : i32
    return %arg0, %arg1, %c0_i32, %c0_i32_0 : i32, i32, i32, i32
  }
}

</mosaic_0001>

<bundles_post_ra>
// kernel: tpu_custom_call.1
= control target key start
LH: loop header
LB: loop body
LE: loop exit
PB: predicated region body
PF: predicated region fallthrough
CT: control target
= control target key end

     0   :  { %s1727_s30 = smov 0   ;;  %s1729_s10 = smov 0   ;;  %s2543_s0 = inlined_call_operand.vmem [shape: f32[2,16,16,8], index: 0, kind: input, shape index: {}]   ;;  %s2544_s1 = inlined_call_operand.vmem [shape: f32[2,16,16,8], index: 1, kind: input, shape index: {}]   ;;  %s2545_s2 = inlined_call_operand.vmem [shape: f32[2,16,16,8], index: 2, kind: input, shape index: {}]   ;;  %s2546_s3 = inlined_call_operand.vmem [shape: f32[8,32], index: 3, kind: input, shape index: {}]   ;;  %s2547_s4 = inlined_call_operand.vmem [shape: f32[1,32], index: 4, kind: input, shape index: {}]   ;;  %s2548_s5 = inlined_call_operand.vmem [shape: f32[9,1,32], index: 5, kind: input, shape index: {}]   ;;  %s2549_s6 = inlined_call_operand.vmem [shape: f32[1,32], index: 6, kind: input, shape index: {}]   ;;  %s2550_s7 = inlined_call_operand.vmem [shape: f32[32,8], index: 7, kind: input, shape index: {}]   ;;  %s2551_s8 = inlined_call_operand.vmem [shape: f32[1,8], index: 8, kind: input, shape index: {}]   ;;  %s2552_s9 = inlined_call_operand.vmem [shape: f32[2,16,16,8], index: 9, kind: output, shape index: {}]  }
   0x1   :  { %s1731_s11 = smov 0   ;;  %s1733_s12 = smov 0  }
   0x2   :  { %s1735_s13 = smov 0  }
   0x3 LB: > { %s28_s14 = sadd.s32 1, %s1666_s11  ;;  %s31_s15 = sadd.s32 1, %s1670_s12  ;;  %s1674_s13 = sphi %s1735_s13, %s19_s13   ;;  %s1670_s12 = sphi %s1733_s12, %s2601_s12   ;;  %s1666_s11 = sphi %s1731_s11, %s2600_s11   ;;  %s1662_s10 = sphi %s1729_s10, %s2599_s10   ;;  %s1658_s30 = sphi %s1727_s30, %s2598_s30  }
   0x4   : > { %p29_p0 = scmp.ge.s32.totalorder %s28_s14, 4  ;;  %p1496_p1 = scmp.ge.s32.totalorder %s1674_s13, 1 }
   0x5   : > { %p373_p2 = scmp.lt.s32.totalorder %s1674_s13, 9 }
   0x6   : > { %s2603_s14 = smov (%p29_p0, %s28_s14), 0  ;;  %s2605_s15 = smov (!%p29_p0, %s31_s15), %s1670_s12 }
   0x7   : > { %p374_p3 = pnand %p1496_p1, %p373_p2  ;;  %p33_p4 = scmp.ge.s32.totalorder %s2605_s15, 2 }
   0x9   : > { %s2607_s15 = smov (%p33_p4, %s2605_s15), 0  ;;  %377 = sbr.rel (%p374_p3) target bundleno = 472 (0x1d8), region = 56 }
   0xe   : > { %v501_v0 = vld [vmem:[%s2546_s3] sm:$0xff]  ;;  %s1763_s18 = sshll.u32 %s1658_s30, 2  ;;  %p446_p5 = scmp.lt.s32.totalorder %s1662_s10, 1  ;;  %vm540_vm0 = vcmask 64512   ;;  %v653_v25 = vlaneseq  ;;  %v1676_v35 = vmov 0.0  }
   0xf   : > { %1562 = vmatpush.msra.mxu2 %v501_v0  ;;  %p448_p6 = scmp.lt.s32.totalorder %s1763_s18, 15  ;;  %592 = vmatpush.msra.mxu0 %v501_v0  ;;  %s1502_s19 = sadd.s32 4294967295, %s1763_s18  ;;  %v1827_v19 = vld [vmem:[%s2547_s4] ss:$0 sm:$0xff]  ;;  %v1835_v22 = vld [vmem:[%s2548_s5 + $0x4] ss:$0 sm:$0xff] }
  0x10   : > { %s2609_s10 = smov (!%p446_p5, %s1662_s10), 1  ;;  %p458_p7 = scmp.gt.s32.totalorder %s1502_s19, 0  ;;  %v502_v26 = vld [vmem:[%s2547_s4] sm:$0x1]  ;;  %v1844_v27 = vshrl.u32 %v653_v25, 7 }
  0x11   : > { %s449_s20 = scalar_select %p448_p6, %s1763_s18, 15  ;;  %v1863_v39 = vld [vmem:[%s2548_s5 + $0x3] ss:$0 sm:$0xff]  ;;  %v1873_v45 = vld [vmem:[%s2548_s5 + $0x7] ss:$0 sm:$0xff] }
  0x12   : > { %s1768_s21 = sshll.u32 %s2609_s10, 5  ;;  %p518_p8 = scmp.eq.s32.totalorder %s1658_s30, 0  ;;  %vm656_vm1 = vcmp.gt.s32.totalorder %v1844_v27, 0  ;;  %vm683_vm2 = vcmp.lt.s32.totalorder %v1844_v27, 1  ;;  %v655_v41 = vadd.s32 8, %v1844_v27  ;;  %vm834_vm4 = vcmp.lt.s32.totalorder %v1844_v27, 7 }
  0x13   : > { %s1498_s22 = sshll.u32 %s449_s20, 1  ;;  %p1503_p9 = scmp.lt.s32.totalorder %s1502_s19, 15  ;;  %v1853_v36 = vsel %vm656_vm1, 1.0, %v1676_v35  ;;  %v1881_v48 = vld [vmem:[%s2548_s5 + $0x1] ss:$0 sm:$0xff] }
  0x14   : > { %s1771_s23 = sadd.s32 %s1768_s21, %s1498_s22  ;;  %s1561_s28 = sadd.s32 4, %s1763_s18  ;;  %vm663_vm3 = vcmp.lt.s32.totalorder %v655_v41, 15  ;;  %v1906_v62 = vld [vmem:[%s2548_s5] ss:$0 sm:$0xff] }
  0x15   : > { %s1500_s24 = sshll.u32 %s1771_s23, 3  ;;  %s2611_s19 = smov (!%p458_p7, %s1502_s19), 0  ;;  %v1889_v54 = vsel %vm663_vm3, 1.0, %v1676_v35  ;;  %v1967_v25 = vld [vmem:[%s2549_s6] ss:$0 sm:$0xff] }
  0x16   : > { %s1780_s27 = scalar_lea.vmem %s2543_s0, %s1500_s24  ;;  %s2613_s19 = smov (!%p1503_p9, %s2611_s19), 15  ;;  %2568 = vst [vmem:[#allocation8_spill] sm:$0xff] %v1967_v25 }
  0x17   : > { %v536_v1 = vld [vmem:[%s1780_s27 + $0x20] sm:$0xff]  ;;  %s519_s29 = scalar_select %p518_p8, 0.0, 1.0  ;;  %v537_v3 = vld [vmem:[%s1780_s27 + $0x28] sm:$0xff]  ;;  %v538_v7 = vld [vmem:[%s1780_s27 + $0x30] sm:$0xff] }
  0x18   : > { %1528 = vmatmul.msk.f32.vlgmr.msra.gmra.mxu2 %vm540_vm0, %v536_v1  ;;  %s1508_s10 = sshll.u32 %s2613_s19, 1  ;;  %p1785_p10 = scmp.lt.s32.totalorder %s1561_s28, 15  ;;  %v539_v9 = vld [vmem:[%s1780_s27 + $0x38] sm:$0xff]  ;;  %v532_v10 = vld [vmem:[%s1780_s27] sm:$0xff]  ;;  %v533_v14 = vld [vmem:[%s1780_s27 + $0x8] sm:$0xff] }
  0x19   : > { %s466_s17 = sadd.s32 %s1508_s10, %s1768_s21  ;;  %v524_v2 = vstv %s519_s29  ;;  %p520_p11 = scmp.eq.s32.totalorder %s1658_s30, 3  ;;  %v534_v17 = vld [vmem:[%s1780_s27 + $0x10] sm:$0xff]  ;;  %v535_v18 = vld [vmem:[%s1780_s27 + $0x18] sm:$0xff] }
  0x1a   : > { %s1510_s20 = sshll.u32 %s466_s17, 3  ;;  %s2615_s28 = smov (!%p1785_p10, %s1561_s28), 15  ;;  %v630_v29 = vmul.f32 %v524_v2, %v502_v26 }
  0x1b   : > { %s468_s25 = scalar_lea.vmem %s2544_s1, %s1510_s20  ;;  %s2617_s28 = smov (!%p1785_p10, %s2615_s28), 15 }
  0x1c   : > { %v522_v4 = vld [vmem:[%s468_s25] sm:$0xff]  ;;  %v523_v6 = vld [vmem:[%s468_s25 + $0x8] sm:$0xff]  ;;  %s1515_s19 = sshll.u32 %s2617_s28, 1  ;;  %v635_v34 = vperm.slane %v630_v29, 0 }
  0x1d   : > { %v525_v5 = vmul.f32 %v524_v2, %v522_v4  ;;  %v526_v8 = vmul.f32 %v524_v2, %v523_v6  ;;  %s483_s26 = sadd.s32 %s1515_s19, %s1768_s21 }
  0x1e   : > { %s1517_s29 = sshll.u32 %s483_s26, 3  ;;  %s499_s26 = scalar_lea.vmem %s2552_s9, %s1500_s24 }
  0x1f   : > { %1522 = vmatmul.msk.f32.vlgmr.msra.gmra.mxu0 %vm540_vm0, %v525_v5  ;;  %s521_s10 = scalar_select %p520_p11, 0.0, 1.0  ;;  %v1923_v5 = vld [vmem:[%s2548_s5 + $0x6] ss:$0 sm:$0xff] }
  0x20   : > { %1529 = vmatmul.msk.f32.gmra.mxu2 %vm540_vm0, %v537_v3  ;;  %s485_s20 = scalar_lea.vmem %s2545_s2, %s1517_s29 }
  0x21   : > { %v527_v11 = vld [vmem:[%s485_s20] sm:$0xff]  ;;  %v1811_v12 = vstv %s521_s10  ;;  %v528_v15 = vld [vmem:[%s485_s20 + $0x8] sm:$0xff] }
  0x22   : > { %v530_v13 = vmul.f32 %v1811_v12, %v527_v11  ;;  %v531_v16 = vmul.f32 %v1811_v12, %v528_v15  ;;  %v1913_v1 = vmul.f32 %v1811_v12, %v502_v26  ;;  %v1953_v15 = vld [vmem:[%s2548_s5 + $0x2] ss:$0 sm:$0xff] }
  0x27   : > { %1523 = vmatmul.msk.f32.gmra.mxu0 %vm540_vm0, %v526_v8  ;;  %v506_v8 = vld [vmem:[%s2550_s7 + $0x18] sm:$0xff] }
  0x28   : > { %1530 = vmatmul.msk.f32.gmra.mxu2 %vm540_vm0, %v538_v7  ;;  %1308 = vmatpush.msra.mxu1 %v506_v8 }
  0x29   : > { %1563 = vmatpush.msra.mxu3 %v506_v8 }
  0x2f   : > { %1524 = vmatmul.msk.f32.gmra.mxu0 %vm540_vm0, %v532_v10 }
  0x30   : > { %1531 = vmatmul.msk.f32.gmra.mxu2 %vm540_vm0, %v539_v9  ;;  %v505_v9 = vld [vmem:[%s2550_s7 + $0x10] sm:$0xff] }
  0x31   : > { %1309 = vmatpush.msra.mxu1 %v505_v9  ;;  %1564 = vmatpush.msra.mxu3 %v505_v9 }
  0x37   : > { %1525 = vmatmul.msk.f32.gmra.mxu0 %vm540_vm0, %v533_v14 }
  0x38   : > { %1532 = vmatmul.msk.f32.gmra.mxu2 %vm540_vm0, %v530_v13 }
  0x3f   : > { %1526 = vmatmul.msk.f32.gmra.mxu0 %vm540_vm0, %v534_v17 }
  0x40   : > { %1533 = vmatmul.msk.f32.gmra.mxu2 %vm540_vm0, %v531_v16 }
  0x47   : > { %1527 = vmatmul.msk.f32.gmra.mxu0 %vm540_vm0, %v535_v18 }
  0x9b   : > { %v612_v20 = vpop.f32.mrf.mxu2 }
  0x9c   : > { %v1830_v21 = vadd.f32 %v1827_v19, %v612_v20  ;;  %v594_v24 = vpop.f32.mrf.mxu0 }
  0x9d   : > { %v641_v44 = vadd.f32 %v635_v34, %v594_v24  ;;  %v504_v24 = vld [vmem:[%s2550_s7 + $0x8] sm:$0xff] }
  0x9e   : > { %2562 = vst [vmem:[#allocation2_spill] sm:$0xff] %v1830_v21  ;;  %v1839_v23 = vmul.f32 %v1835_v22, %v1830_v21  ;;  %v674_v30 = vrot.slane %v1830_v21, 7  ;;  %v825_v51 = vrot.slane %v1830_v21, 1  ;;  %v1899_v59 = vmul.f32 %v1881_v48, %v1830_v21  ;;  %1310 = vmatpush.msra.mxu1 %v504_v24  ;;  %1565 = vmatpush.msra.mxu3 %v504_v24 }
  0x9f   : > { %v671_v50 = vrot.slane %v641_v44, 7  ;;  %v1895_v57 = vmul.f32 %v1881_v48, %v641_v44  ;;  %v822_v58 = vrot.slane %v641_v44, 1 }
  0xa0   : > { %2563 = vst [vmem:[#allocation3_spill] sm:$0xff] %v1839_v23 }
  0xa3   : > { %v615_v28 = vpop.f32.mrf.mxu2 }
  0xa4   : > { %v1848_v31 = vadd.f32 %v1827_v19, %v615_v28  ;;  %v597_v33 = vpop.f32.mrf.mxu0 }
  0xa5   : > { %v642_v40 = vadd.f32 %v635_v34, %v597_v33 }
  0xa6   : > { %2564 = vst [vmem:[#allocation4_spill] sm:$0xff] %v1848_v31  ;;  %v680_v32 = vrot.slane %v1848_v31, 7  ;;  %v831_v52 = vrot.slane %v1848_v31, 1  ;;  %v1927_v6 = vmul.f32 %v1835_v22, %v1848_v31  ;;  %v1931_v7 = vmul.f32 %v1881_v48, %v1848_v31 }
  0xa7   : > { %v677_v46 = vrot.slane %v642_v40, 7  ;;  %v828_v56 = vrot.slane %v642_v40, 1  ;;  %v1986_v41 = vmul.f32 %v1881_v48, %v642_v40 }
  0xa8   : > { %v693_v37 = vsel %vm683_vm2, %v680_v32, %v674_v30  ;;  %v687_v60 = vsel %vm683_vm2, %v674_v30, %v680_v32  ;;  %v844_v2 = vsel %vm834_vm4, %v831_v52, %v825_v51  ;;  %v637_v30 = vperm.slane %v1913_v1, 0 }
  0xa9   : > { %v1858_v38 = vmul.f32 %v1853_v36, %v693_v37  ;;  %v690_v55 = vsel %vm683_vm2, %v677_v46, %v671_v50  ;;  %v684_v3 = vsel %vm683_vm2, %v671_v50, %v677_v46  ;;  %v841_v10 = vsel %vm834_vm4, %v828_v56, %v822_v58  ;;  %v503_v37 = vld [vmem:[%s2550_s7] sm:$0xff] }
  0xaa   : > { %v696_v4 = vmul.f32 %v1853_v36, %v690_v55  ;;  %v1942_v11 = vmul.f32 %v1863_v39, %v687_v60  ;;  %v835_v14 = vsel %vm834_vm4, %v822_v58, %v828_v56  ;;  %v718_v18 = vmul.f32 %v1906_v62, %v687_v60  ;;  %v1993_v46 = vld [vmem:[%s2548_s5 + $0x5] ss:$0 sm:$0xff]  ;;  %1311 = vmatpush.msra.mxu1 %v503_v37 }
  0xab   : > { %v1868_v42 = vmul.f32 %v1863_v39, %v1858_v38  ;;  %v618_v43 = vpop.f32.mrf.mxu2  ;;  %v717_v17 = vmul.f32 %v1906_v62, %v1858_v38  ;;  %v1959_v20 = vmul.f32 %v1889_v54, %v844_v2  ;;  %v712_v26 = vmul.f32 %v1906_v62, %v684_v3  ;;  %1566 = vmatpush.msra.mxu3 %v503_v37 }
  0xac   : > { %v1876_v47 = vadd.f32 %v1827_v19, %v618_v43  ;;  %v600_v49 = vpop.f32.mrf.mxu0  ;;  %v711_v32 = vmul.f32 %v1906_v62, %v696_v4  ;;  %v848_v33 = vmul.f32 %v1889_v54, %v841_v10  ;;  %v1979_v34 = vmul.f32 %v1923_v5, %v687_v60 }
  0xad   : > { %2565 = vst [vmem:[#allocation5_spill] sm:$0xff] %v1868_v42  ;;  %v1945_v12 = vadd.f32 %v1827_v19, %v600_v49  ;;  %v1997_v49 = vsel %vm834_vm4, %v825_v51, %v831_v52  ;;  %v2000_v50 = vmul.f32 %v1953_v15, %v835_v14  ;;  %v725_v56 = vadd.f32 %v1967_v25, %v717_v17 }
  0xae   : > { %v1887_v53 = vmul.f32 %v1873_v45, %v1876_v47  ;;  %v675_v63 = vrot.slane %v1876_v47, 7  ;;  %2567 = vst [vmem:[#allocation7_spill] sm:$0xff] %v1959_v20  ;;  %v726_v58 = vadd.f32 %v1967_v25, %v718_v18  ;;  %v720_v60 = vadd.f32 %v1967_v25, %v712_v26 }
  0xaf   : > { %v672_v43 = vrot.slane %v1945_v12, 7  ;;  %2569 = vst [vmem:[#allocation9_spill] sm:$0xff] %v1997_v49  ;;  %v2012_v51 = vmul.f32 %v1953_v15, %v1959_v20  ;;  %v2016_v52 = vmul.f32 %v1993_v46, %v1959_v20  ;;  %v719_v1 = vadd.f32 %v1967_v25, %v711_v32 }
  0xb0   : > { %2566 = vst [vmem:[#allocation6_spill] sm:$0xff] %v1887_v53  ;;  %v2020_v2 = vmul.f32 %v1953_v15, %v848_v33  ;;  %v2024_v3 = vmul.f32 %v1835_v22, %v1876_v47  ;;  %v2028_v4 = vmul.f32 %v1953_v15, %v1997_v49  ;;  %v826_v8 = vrot.slane %v1876_v47, 1 }
  0xb1   : > { %2571 = vst [vmem:[#allocation11_spill] sm:$0xff] %v2016_v52  ;;  %v2036_v14 = vmul.f32 %v1923_v5, %v1858_v38 }
  0xb3   : > { %v621_v61 = vpop.f32.mrf.mxu2 }
  0xb4   : > { %v1910_v0 = vadd.f32 %v1827_v19, %v621_v61  ;;  %v603_v16 = vpop.f32.mrf.mxu0 }
  0xb5   : > { %v1971_v28 = vadd.f32 %v1827_v19, %v603_v16  ;;  %v2040_v16 = vmul.f32 %v1881_v48, %v1945_v12 }
  0xb6   : > { %v681_v13 = vrot.slane %v1910_v0, 7  ;;  %v832_v10 = vrot.slane %v1910_v0, 1  ;;  %v794_v33 = vmul.f32 %v1835_v22, %v1910_v0  ;;  %v2060_v37 = vmul.f32 %v1873_v45, %v1910_v0 }
  0xb7   : > { %v678_v44 = vrot.slane %v1971_v28, 7  ;;  %v829_v47 = vrot.slane %v1971_v28, 1  ;;  %v2076_v0 = vmul.f32 %v1881_v48, %v1971_v28  ;;  %v2087_v42 = vmul.f32 %v1835_v22, %v1971_v28 }
  0xb8   : > { %v694_v29 = vsel %vm683_vm2, %v681_v13, %v675_v63  ;;  %v688_v9 = vsel %vm683_vm2, %v675_v63, %v681_v13  ;;  %v2048_v63 = vmul.f32 %v1835_v22, %v1945_v12  ;;  %v823_v13 = vrot.slane %v1945_v12, 1 }
  0xb9   : > { %v704_v35 = vmul.f32 %v1853_v36, %v694_v29  ;;  %v691_v61 = vsel %vm683_vm2, %v678_v44, %v672_v43  ;;  %v685_v17 = vsel %vm683_vm2, %v672_v43, %v678_v44  ;;  %v737_v32 = vmul.f32 %v1863_v39, %v688_v9 }
  0xba   : > { %v698_v18 = vmul.f32 %v1853_v36, %v691_v61  ;;  %v714_v43 = vmul.f32 %v1906_v62, %v685_v17  ;;  %v2064_v44 = vmul.f32 %v1923_v5, %v688_v9  ;;  %v731_v61 = vmul.f32 %v1863_v39, %v685_v17 }
  0xbb   : > { %v2003_v40 = vmul.f32 %v1923_v5, %v704_v35  ;;  %v624_v55 = vpop.f32.mrf.mxu2  ;;  %v736_v29 = vmul.f32 %v1863_v39, %v704_v35  ;;  %v845_v35 = vsel %vm834_vm4, %v832_v10, %v826_v8  ;;  %v745_v20 = vadd.f32 %v737_v32, %v726_v58 }
  0xbc   : > { %v606_v24 = vpop.f32.mrf.mxu0  ;;  %v651_v26 = vadd.f32 %v637_v30, %v624_v55  ;;  %v713_v55 = vmul.f32 %v1906_v62, %v698_v18  ;;  %v730_v53 = vmul.f32 %v1863_v39, %v698_v18  ;;  %v2090_v31 = vmul.f32 %v1889_v54, %v845_v35 }
  0xbd   : > { %2570 = vst [vmem:[#allocation10_spill] sm:$0xff] %v2003_v40  ;;  %v2052_v38 = vadd.f32 %v1827_v19, %v606_v24  ;;  %v842_v24 = vsel %vm834_vm4, %v829_v47, %v823_v13  ;;  %v744_v17 = vadd.f32 %v736_v29, %v725_v56  ;;  %v722_v49 = vadd.f32 %v1967_v25, %v714_v43 }
  0xbe   : > { %v676_v23 = vrot.slane %v651_v26, 7  ;;  %v812_v52 = vmul.f32 %v1873_v45, %v651_v26  ;;  %v827_v18 = vrot.slane %v651_v26, 1  ;;  %v2100_v28 = vmul.f32 %v1889_v54, %v842_v24 }
  0xbf   : > { %v2068_v12 = vmul.f32 %v1881_v48, %v2052_v38  ;;  %v738_v56 = vadd.f32 %v730_v53, %v719_v1  ;;  %v2114_v35 = vsel %vm834_vm4, %v826_v8, %v832_v10  ;;  %v806_v53 = vmul.f32 %v1873_v45, %v2052_v38 }
  0xc0   : > { %2574 = vst [vmem:[#allocation14_spill] sm:$0xff] %v2100_v28  ;;  %v2127_v24 = vmul.f32 %v1993_v46, %v2100_v28 }
  0xc1   : > { %2572 = vst [vmem:[#allocation12_spill] sm:$0xff] %v2068_v12  ;;  %v2083_v12 = vsel %vm834_vm4, %v823_v13, %v829_v47 }
  0xc2   : > { %2573 = vst [vmem:[#allocation13_spill] sm:$0xff] %v2083_v12  ;;  %v2097_v13 = vmul.f32 %v1993_v46, %v2083_v12 }
  0xc3   : > { %v627_v9 = vpop.f32.mrf.mxu2 }
  0xc4   : > { %v652_v40 = vadd.f32 %v637_v30, %v627_v9  ;;  %v721_v30 = vadd.f32 %v1967_v25, %v713_v55  ;;  %v739_v9 = vadd.f32 %v731_v61, %v720_v60  ;;  %v609_v47 = vpop.f32.mrf.mxu0  ;;  %v673_v60 = vrot.slane %v2052_v38, 7 }
  0xc5   : > { %v2103_v58 = vadd.f32 %v1827_v19, %v609_v47  ;;  %v2118_v19 = vmul.f32 %v1835_v22, %v2052_v38 }
  0xc6   : > { %v682_v21 = vrot.slane %v652_v40, 7 }
  0xc7   : > { %v679_v1 = vrot.slane %v2103_v58, 7  ;;  %v830_v47 = vrot.slane %v2103_v58, 1 }
  0xc8   : > { %v689_v29 = vsel %vm683_vm2, %v676_v23, %v682_v21  ;;  %v695_v26 = vsel %vm683_vm2, %v682_v21, %v676_v23  ;;  %v833_v21 = vrot.slane %v652_v40, 1  ;;  %v824_v23 = vrot.slane %v2052_v38, 1 }
  0xc9   : > { %v706_v32 = vmul.f32 %v1853_v36, %v695_v26  ;;  %v756_v43 = vmul.f32 %v1923_v5, %v689_v29  ;;  %v686_v8 = vsel %vm683_vm2, %v673_v60, %v679_v1  ;;  %v692_v10 = vsel %vm683_vm2, %v679_v1, %v673_v60 }
  0xca   : > { %v813_v29 = vmul.f32 %v1873_v45, %v652_v40  ;;  %v700_v26 = vmul.f32 %v1853_v36, %v692_v10  ;;  %v716_v38 = vmul.f32 %v1906_v62, %v686_v8  ;;  %v840_v12 = vsel %vm834_vm4, %v827_v18, %v833_v21 }
  0xcb   : > { %v755_v55 = vmul.f32 %v1923_v5, %v706_v32  ;;  %v764_v61 = vadd.f32 %v756_v43, %v745_v20  ;;  %v733_v20 = vmul.f32 %v1863_v39, %v686_v8  ;;  %v750_v32 = vmul.f32 %v1923_v5, %v686_v8 }
  0xcc   : > { %v846_v60 = vsel %vm834_vm4, %v833_v21, %v827_v18  ;;  %v2145_v1 = vmul.f32 %v1906_v62, %v700_v26  ;;  %v724_v36 = vadd.f32 %v1967_v25, %v716_v38  ;;  %v732_v40 = vmul.f32 %v1863_v39, %v700_v26 }
  0xcd   : > { %v763_v43 = vadd.f32 %v755_v55, %v744_v17  ;;  %v783_v28 = vadd.f32 %v1931_v7, %v764_v61  ;;  %v741_v10 = vadd.f32 %v733_v20, %v722_v49  ;;  %v773_v8 = vmul.f32 %v1881_v48, %v2103_v58 }
  0xce   : > { %v749_v55 = vmul.f32 %v1923_v5, %v700_v26  ;;  %v743_v61 = vadd.f32 %v1942_v11, %v724_v36  ;;  %v843_v62 = vsel %vm834_vm4, %v830_v47, %v824_v23  ;;  %v758_v21 = vadd.f32 %v750_v32, %v739_v9 }
  0xcf   : > { %v782_v17 = vadd.f32 %v1899_v59, %v763_v43  ;;  %v802_v7 = vadd.f32 %v794_v33, %v783_v28  ;;  %v760_v18 = vadd.f32 %v1979_v34, %v741_v10  ;;  %v740_v49 = vadd.f32 %v732_v40, %v721_v30  ;;  %v2576_v40 = vld [vmem:[#allocation11_spill] sm:$0xff] }
  0xd0   : > { %v757_v25 = vadd.f32 %v749_v55, %v738_v56  ;;  %v762_v48 = vadd.f32 %v2064_v44, %v743_v61  ;;  %v790_v5 = vmul.f32 %v1835_v22, %v2103_v58  ;;  %v777_v11 = vadd.f32 %v1986_v41, %v758_v21  ;;  %v2176_v41 = vld [vmem:[%s2548_s5 + $0x8] ss:$0 sm:$0xff] }
  0xd1   : > { %v821_v38 = vadd.f32 %v813_v29, %v802_v7  ;;  %v801_v39 = vadd.f32 %v2024_v3, %v782_v17  ;;  %v779_v59 = vadd.f32 %v2076_v0, %v760_v18  ;;  %v807_v34 = vmul.f32 %v1873_v45, %v2103_v58  ;;  %v2577_v17 = vld [vmem:[#allocation9_spill] sm:$0xff] }
  0xd2   : > { %v776_v33 = vadd.f32 %v1895_v57, %v757_v25  ;;  %v2167_v9 = vmul.f32 %v1889_v54, %v843_v62  ;;  %v781_v3 = vadd.f32 %v773_v8, %v762_v48  ;;  %v796_v44 = vadd.f32 %v2087_v42, %v777_v11 }
  0xd3   : > { %v820_v28 = vadd.f32 %v812_v52, %v801_v39  ;;  %v798_v30 = vadd.f32 %v790_v5, %v779_v59  ;;  %v759_v0 = vadd.f32 %v2036_v14, %v740_v49  ;;  %v877_v56 = vadd.f32 %v2012_v51, %v821_v38  ;;  %v2578_v49 = vld [vmem:[#allocation13_spill] sm:$0xff]  ;;  %v2579_v59 = vld [vmem:[#allocation4_spill] sm:$0xff] }
  0xd4   : > { %v795_v22 = vadd.f32 %v2048_v63, %v776_v33  ;;  %v887_v25 = vmul.f32 %v1993_v46, %v2114_v35  ;;  %v858_v52 = vmul.f32 %v1889_v54, %v846_v60  ;;  %v800_v42 = vadd.f32 %v1927_v6, %v781_v3  ;;  %v2575_v60 = vld [vmem:[#allocation2_spill] sm:$0xff] }
  0xd5   : > { %v876_v57 = vadd.f32 %v2028_v4, %v820_v28  ;;  %v815_v58 = vadd.f32 %v807_v34, %v796_v44  ;;  %v778_v14 = vadd.f32 %v2040_v16, %v759_v0  ;;  %v906_v63 = vmul.f32 %v2176_v41, %v840_v12 }
  0xd6   : > { %v814_v51 = vadd.f32 %v806_v53, %v795_v22  ;;  %v888_v26 = vmul.f32 %v1993_v46, %v2090_v31  ;;  %v2189_v4 = vsel %vm834_vm4, %v824_v23, %v830_v47  ;;  %v819_v20 = vadd.f32 %v2060_v37, %v800_v42 }
  0xd7   : > { %v895_v29 = vadd.f32 %v887_v25, %v876_v57  ;;  %v867_v54 = vmul.f32 %v1953_v15, %v2167_v9  ;;  %v871_v6 = vadd.f32 %v2020_v2, %v815_v58  ;;  %v901_v53 = vmul.f32 %v2176_v41, %v2167_v9 }
  0xd8   : > { %v870_v16 = vadd.f32 %v2000_v50, %v814_v51  ;;  %v896_v32 = vadd.f32 %v888_v26, %v877_v56  ;;  %v797_v23 = vadd.f32 %v2118_v19, %v778_v14  ;;  %v907_v37 = vmul.f32 %v2176_v41, %v858_v52 }
  0xd9   : > { %v2198_v12 = vadd.f32 %v906_v63, %v895_v29  ;;  %v875_v43 = vadd.f32 %v867_v54, %v819_v20  ;;  %v890_v27 = vadd.f32 %v2127_v24, %v871_v6  ;;  %v900_v2 = vmul.f32 %v2176_v41, %v2189_v4 }
  0xda   : > { %v889_v47 = vadd.f32 %v2097_v13, %v870_v16  ;;  %v808_v36 = vmul.f32 %v1873_v45, %v2575_v60  ;;  %v905_v24 = vmul.f32 %v2176_v41, %v2090_v31  ;;  %v2222_v7 = vmul.f32 %v1993_v46, %v2577_v17 }
  0xdb   : > { %v2207_v50 = vmul.f32 0.70710677, %v2198_v12  ;;  %v894_v10 = vadd.f32 %v2576_v40, %v875_v43  ;;  %v2214_v8 = vadd.f32 %v901_v53, %v890_v27  ;;  %v2229_v62 = vadd.f32 %v907_v37, %v896_v32 }
  0xdc   : > { %v2216_v19 = vadd.f32 %v900_v2, %v889_v47  ;;  %v816_v18 = vadd.f32 %v808_v36, %v797_v23  ;;  %v864_v48 = vmul.f32 %v1953_v15, %v2578_v49  ;;  %v809_v5 = vmul.f32 %v1873_v45, %v2579_v59 }
  0xdd   : > { %v1172_v13 = vmul.f32 %v2207_v50, %v2207_v50  ;;  %v2224_v55 = vadd.f32 %v905_v24, %v894_v10  ;;  %v2227_v61 = vmul.f32 0.70710677, %v2214_v8  ;;  %v2254_v0 = vmul.f32 0.70710677, %v2229_v62 }
  0xde   : > { %v2232_v31 = vmul.f32 0.70710677, %v2216_v19  ;;  %v872_v44 = vadd.f32 %v864_v48, %v816_v18  ;;  %v2258_v57 = vadd.f32 %v809_v5, %v798_v30  ;;  %v883_v58 = vmul.f32 %v1993_v46, %v2189_v4 }
  0xdf   : > { %v2234_v21 = vmin.f32 %v1172_v13, 16.0  ;;  %v2237_v38 = vmul.f32 0.70710677, %v2224_v55  ;;  %v972_v39 = vmul.f32 %v2227_v61, %v2227_v61  ;;  %v902_v54 = vmul.f32 %v2176_v41, %v2577_v17 }
  0xe0   : > { %v932_v11 = vmul.f32 %v2232_v31, %v2232_v31  ;;  %v891_v32 = vadd.f32 %v883_v58, %v872_v44 }
  0xe1   : > { %v1174_v34 = vmul.f32 2.1237322e-06, %v2234_v21  ;;  %v1185_v33 = vmul.f32 3.8918573e-05, %v2234_v21  ;;  %v1132_v28 = vmul.f32 %v2237_v38, %v2237_v38  ;;  %v2251_v3 = vmin.f32 %v972_v39, 16.0 }
  0xe2   : > { %v2256_v56 = vmin.f32 %v932_v11, 16.0 }
  0xe3   : > { %v1175_v22 = vadd.f32 0.00028619796, %v1174_v34  ;;  %v1186_v45 = vadd.f32 0.001143296, %v1185_v33  ;;  %v2260_v25 = vmin.f32 %v1132_v28, 16.0 }
  0xe4   : > { %v974_v52 = vmul.f32 2.1237322e-06, %v2251_v3  ;;  %v985_v42 = vmul.f32 3.8918573e-05, %v2251_v3  ;;  %v934_v14 = vmul.f32 2.1237322e-06, %v2256_v56 }
  0xe5   : > { %v945_v51 = vmul.f32 3.8918573e-05, %v2256_v56  ;;  %v1176_v29 = vmul.f32 %v1175_v22, %v2234_v21  ;;  %v1187_v63 = vmul.f32 %v1186_v45, %v2234_v21  ;;  %v1134_v30 = vmul.f32 2.1237322e-06, %v2260_v25 }
  0xe6   : > { %v1145_v26 = vmul.f32 3.8918573e-05, %v2260_v25  ;;  %v975_v20 = vadd.f32 0.00028619796, %v974_v52  ;;  %v935_v6 = vadd.f32 0.00028619796, %v934_v14 }
  0xe7   : > { %v946_v16 = vadd.f32 0.001143296, %v945_v51  ;;  %v986_v53 = vadd.f32 0.001143296, %v985_v42  ;;  %v1135_v43 = vadd.f32 0.00028619796, %v1134_v30 }
  0xe8   : > { %v1146_v27 = vadd.f32 0.001143296, %v1145_v26  ;;  %v976_v23 = vmul.f32 %v975_v20, %v2251_v3  ;;  %v1177_v37 = vadd.f32 0.0036580483, %v1176_v29  ;;  %v936_v47 = vmul.f32 %v935_v6, %v2256_v56 }
  0xe9   : > { %v947_v2 = vmul.f32 %v946_v16, %v2256_v56  ;;  %v987_v60 = vmul.f32 %v986_v53, %v2251_v3  ;;  %v1188_v36 = vadd.f32 0.014752088, %v1187_v63  ;;  %v1136_v40 = vmul.f32 %v1135_v43, %v2260_v25 }
  0xea   : > { %v1147_v10 = vmul.f32 %v1146_v27, %v2260_v25  ;;  %v977_v24 = vadd.f32 0.0036580483, %v976_v23  ;;  %v1178_v13 = vmul.f32 %v1177_v37, %v2234_v21  ;;  %v937_v17 = vadd.f32 0.0036580483, %v936_v47 }
  0xeb   : > { %v948_v18 = vadd.f32 0.014752088, %v947_v2  ;;  %v988_v39 = vadd.f32 0.014752088, %v987_v60  ;;  %v1189_v49 = vmul.f32 %v1188_v36, %v2234_v21  ;;  %v1137_v48 = vadd.f32 0.0036580483, %v1136_v40 }
  0xec   : > { %v1148_v59 = vadd.f32 0.014752088, %v1147_v10  ;;  %v978_v5 = vmul.f32 %v977_v24, %v2251_v3  ;;  %v1179_v11 = vadd.f32 0.05243302, %v1178_v13  ;;  %v938_v34 = vmul.f32 %v937_v17, %v2256_v56 }
  0xed   : > { %v949_v33 = vmul.f32 %v948_v18, %v2256_v56  ;;  %v989_v28 = vmul.f32 %v988_v39, %v2251_v3  ;;  %v1190_v44 = vadd.f32 0.112945676, %v1189_v49  ;;  %v1138_v22 = vmul.f32 %v1137_v48, %v2260_v25 }
  0xee   : > { %v1149_v45 = vmul.f32 %v1148_v59, %v2260_v25  ;;  %v979_v52 = vadd.f32 0.05243302, %v978_v5  ;;  %v1180_v42 = vmul.f32 %v1179_v11, %v2234_v21  ;;  %v939_v58 = vadd.f32 0.05243302, %v938_v34 }
  0xef   : > { %v950_v14 = vadd.f32 0.112945676, %v949_v33  ;;  %v990_v51 = vadd.f32 0.112945676, %v989_v28  ;;  %v1191_v29 = vmul.f32 %v1190_v44, %v2234_v21  ;;  %v1139_v63 = vadd.f32 0.05243302, %v1138_v22 }
  0xf0   : > { %v1150_v30 = vadd.f32 0.112945676, %v1149_v45  ;;  %v980_v26 = vmul.f32 %v979_v52, %v2251_v3  ;;  %v2291_v20 = vadd.f32 %v902_v54, %v891_v32  ;;  %v940_v6 = vmul.f32 %v939_v58, %v2256_v56  ;;  %v2580_v52 = vld [vmem:[#allocation14_spill] sm:$0xff] }
  0xf1   : > { %v951_v16 = vmul.f32 %v950_v14, %v2256_v56  ;;  %v991_v53 = vmul.f32 %v990_v51, %v2251_v3  ;;  %v1181_v43 = vadd.f32 0.18741608, %v1180_v42  ;;  %v1140_v27 = vmul.f32 %v1139_v63, %v2260_v25 }
  0xf2   : > { %v1151_v23 = vmul.f32 %v1150_v30, %v2260_v25  ;;  %v981_v37 = vadd.f32 0.18741608, %v980_v26  ;;  %v1192_v47 = vadd.f32 0.4994258, %v1191_v29  ;;  %v941_v2 = vadd.f32 0.18741608, %v940_v6 }
  0xf3   : > { %v952_v60 = vadd.f32 0.4994258, %v951_v16  ;;  %v992_v36 = vadd.f32 0.4994258, %v991_v53  ;;  %v1212_v54 = vmul.f32 %v2254_v0, %v2254_v0  ;;  %v1141_v32 = vadd.f32 0.18741608, %v1140_v27 }
  0xf4   : > { %v1152_v40 = vadd.f32 0.4994258, %v1151_v23  ;;  %v1182_v10 = vmul.f32 %v1181_v43, %v2234_v21  ;;  %v1193_v24 = vmul.f32 %v1192_v47, %v2234_v21  ;;  %v942_v13 = vmul.f32 %v941_v2, %v2256_v56 }
  0xf5   : > { %v953_v17 = vmul.f32 %v952_v60, %v2256_v56  ;;  %v982_v18 = vmul.f32 %v981_v37, %v2251_v3  ;;  %v993_v39 = vmul.f32 %v992_v36, %v2251_v3  ;;  %v1142_v49 = vmul.f32 %v1141_v32, %v2260_v25 }
  0xf6   : > { %v1153_v48 = vmul.f32 %v1152_v40, %v2260_v25  ;;  %v2308_v59 = vadd.f32 1.0, %v1193_v24  ;;  %v2311_v5 = vmul.f32 0.70710677, %v2291_v20  ;;  %v2320_v56 = vmin.f32 %v1212_v54, 16.0 }
  0xf7   : > { %v2313_v11 = vadd.f32 1.0, %v953_v17  ;;  %v2315_v21 = vadd.f32 1.0, %v993_v39  ;;  %v943_v3 = vadd.f32 1.1283791, %v942_v13  ;;  %v983_v33 = vadd.f32 1.1283791, %v982_v18 }
  0xf8   : > { %v2317_v34 = vadd.f32 1.0, %v1153_v48  ;;  %1620 = vrcp.f32 %v2308_v59  ;;  %v1183_v25 = vadd.f32 1.1283791, %v1182_v10  ;;  %v1143_v28 = vadd.f32 1.1283791, %v1142_v49 }
  0xf9   : > { %1622 = vrcp.f32 %v2313_v11  ;;  %v1012_v44 = vmul.f32 %v2311_v5, %v2311_v5  ;;  %v966_v22 = vand.u32 2147483648, %v2313_v11  ;;  %v2331_v42 = vmul.f32 %v1953_v15, %v2580_v52 }
  0xfa   : > { %1624 = vrcp.f32 %v2317_v34  ;;  %v1166_v45 = vand.u32 2147483648, %v2317_v34  ;;  %v964_v58 = vand.u32 2147483647, %v2313_v11  ;;  %v1006_v14 = vand.u32 2147483648, %v2315_v21 }
  0xfb   : > { %1626 = vrcp.f32 %v2315_v21  ;;  %v1214_v51 = vmul.f32 2.1237322e-06, %v2320_v56  ;;  %v2338_v29 = vmul.f32 %v1993_v46, %v2167_v9  ;;  %v2341_v63 = vmul.f32 %v943_v3, %v2232_v31 }
  0xfc   : > { %v1164_v30 = vand.u32 2147483647, %v2317_v34  ;;  %v2345_v26 = vmul.f32 %v983_v33, %v2227_v61  ;;  %v2348_v6 = vmul.f32 %v1183_v25, %v2207_v50  ;;  %vm960_vm5 = vweird.f32 %v2313_v11 }
  0xfd   : > { %v2352_v53 = vmul.f32 %v1143_v28, %v2237_v38  ;;  %v1004_v46 = vand.u32 2147483647, %v2315_v21  ;;  %v1204_v9 = vand.u32 2147483647, %v2308_v59  ;;  %v2356_v31 = vmin.f32 %v1012_v44, 16.0  ;;  %v2591_v38 = vld [vmem:[#allocation7_spill] sm:$0xff] }
  0xfe   : > { %v1621_v16 = vpop.eup %1620  ;;  %v967_v27 = vor.u32 1.1754944e-38, %v966_v22  ;;  %vm1160_vm6 = vweird.f32 %v2317_v34  ;;  %v1167_v61 = vor.u32 1.1754944e-38, %v1166_v45  ;;  %vm1200_vm7 = vweird.f32 %v2308_v59 }
  0xff   : > { %v1623_v43 = vpop.eup %1622  ;;  %v1196_v50 = vmul.f32 %v1621_v16, %v2308_v59  ;;  %vm2362_vm8 = vcmp.eq.f32.partialorder %v964_v58, 8.507059e+37  ;;  %vm1000_vm9 = vweird.f32 %v2315_v21  ;;  %v1007_v47 = vor.u32 1.1754944e-38, %v1006_v14 }
 0x100   : > { %v1625_v23 = vpop.eup %1624  ;;  %v956_v37 = vmul.f32 %v1623_v43, %v2313_v11  ;;  %v1206_v2 = vand.u32 2147483648, %v2308_v59  ;;  %v1014_v60 = vmul.f32 2.1237322e-06, %v2356_v31  ;;  %vm2370_vm10 = vcmp.eq.f32.partialorder %v1164_v30, 8.507059e+37 }
 0x101   : > { %v1627_v36 = vpop.eup %1626  ;;  %v1156_v54 = vmul.f32 %v1625_v23, %v2317_v34  ;;  %v1197_v40 = vsub.f32 1.0, %v1196_v50  ;;  %vm1201_vm11 = vweird.f32 %v1621_v16  ;;  %v1025_v10 = vmul.f32 3.8918573e-05, %v2356_v31 }
 0x102   : > { %v957_v24 = vsub.f32 1.0, %v956_v37  ;;  %v996_v13 = vmul.f32 %v1627_v36, %v2315_v21  ;;  %vm2376_vm12 = vcmp.eq.f32.partialorder %v1004_v46, 8.507059e+37  ;;  %vm2380_vm13 = vcmp.eq.f32.partialorder %v1204_v9, 8.507059e+37  ;;  %vm2390_vm2 = vmor %vm1200_vm7, %vm1201_vm11 }
 0x103   : > { %v1015_v39 = vadd.f32 0.00028619796, %v1014_v60  ;;  %vm961_vm14 = vweird.f32 %v1623_v43  ;;  %v1157_v49 = vsub.f32 1.0, %v1156_v54  ;;  %v1198_v48 = vmul.f32 %v1621_v16, %v1197_v40 }
 0x104   : > { %v1026_v3 = vadd.f32 0.001143296, %v1025_v10  ;;  %v958_v33 = vmul.f32 %v1623_v43, %v957_v24  ;;  %v997_v25 = vsub.f32 1.0, %v996_v13  ;;  %v1225_v44 = vmul.f32 3.8918573e-05, %v2320_v56  ;;  %vm962_vm3 = vmor %vm960_vm5, %vm961_vm14 }
 0x105   : > { %v1016_v28 = vmul.f32 %v1015_v39, %v2356_v31  ;;  %v1158_v22 = vmul.f32 %v1625_v23, %v1157_v49  ;;  %vm1161_vm15 = vweird.f32 %v1625_v23  ;;  %v1199_v45 = vadd.f32 %v1621_v16, %v1198_v48 }
 0x106   : > { %v1027_v52 = vmul.f32 %v1026_v3, %v2356_v31  ;;  %v959_v58 = vadd.f32 %v1623_v43, %v958_v33  ;;  %v998_v14 = vmul.f32 %v1627_v36, %v997_v25  ;;  %vm1001_vm1 = vweird.f32 %v1627_v36  ;;  %vm1162_vm4 = vmor %vm1160_vm6, %vm1161_vm15 }
 0x107   : > { %v1215_v46 = vadd.f32 0.00028619796, %v1214_v51  ;;  %v1159_v9 = vadd.f32 %v1625_v23, %v1158_v22  ;;  %v1203_v50 = vsel %vm2390_vm2, %v1621_v16, %v1199_v45  ;;  %v1207_v37 = vor.u32 1.1754944e-38, %v1206_v2  ;;  %vm1002_vm5 = vmor %vm1000_vm9, %vm1001_vm1 }
 0x108   : > { %v1028_v60 = vadd.f32 0.014752088, %v1027_v52  ;;  %v963_v54 = vsel %vm962_vm3, %v1623_v43, %v959_v58  ;;  %v999_v59 = vadd.f32 %v1627_v36, %v998_v14  ;;  %v1017_v40 = vadd.f32 0.0036580483, %v1016_v28 }
 0x109   : > { %v1226_v10 = vadd.f32 0.001143296, %v1225_v44  ;;  %v968_v51 = vsel %vm2362_vm8, %v967_v27, %v963_v54  ;;  %v1163_v24 = vsel %vm1162_vm4, %v1625_v23, %v1159_v9  ;;  %v1208_v11 = vsel %vm2380_vm13, %v1207_v37, %v1203_v50 }
 0x10a   : > { %v1029_v16 = vmul.f32 %v1028_v60, %v2356_v31  ;;  %v969_v43 = vmul.f32 %v968_v51, %v2341_v63  ;;  %v1168_v34 = vsel %vm2370_vm10, %v1167_v61, %v1163_v24  ;;  %v1003_v2 = vsel %vm1002_vm5, %v1627_v36, %v999_v59  ;;  %v2593_v60 = vld [vmem:[#allocation5_spill] sm:$0xff]  ;;  %v2594_v24 = vld [vmem:[#allocation10_spill] sm:$0xff] }
 0x10b   : > { %v1216_v13 = vmul.f32 %v1215_v46, %v2320_v56  ;;  %v1169_v27 = vmul.f32 %v1168_v34, %v2352_v53  ;;  %v1008_v23 = vsel %vm2376_vm12, %v1007_v47, %v1003_v2  ;;  %v903_v18 = vmul.f32 %v2176_v41, %v2591_v38 }
 0x10c   : > { %v1030_v21 = vadd.f32 0.112945676, %v1029_v16  ;;  %v1536_v39 = vclamps-f32 %v969_v43, 1.0  ;;  %v1009_v49 = vmul.f32 %v1008_v23, %v2345_v26  ;;  %v1209_v63 = vmul.f32 %v1208_v11, %v2348_v6 }
 0x10d   : > { %v1018_v32 = vmul.f32 %v1017_v40, %v2356_v31  ;;  %v1541_v61 = vclamps-f32 %v1169_v27, 1.0  ;;  %v1227_v48 = vmul.f32 %v1226_v10, %v2320_v56  ;;  %v873_v53 = vadd.f32 %v2331_v42, %v2258_v57  ;;  %v2595_v27 = vld [vmem:[#allocation12_spill] sm:$0xff] }
 0x10e   : > { %v1031_v36 = vmul.f32 %v1030_v21, %v2356_v31  ;;  %v916_v47 = vmul.f32 0.5, %v2216_v19  ;;  %v1252_v17 = vadd.f32 1.0, %v1536_v39  ;;  %v921_v3 = vmul.f32 0.5, %v2224_v55  ;;  %v2592_v55 = vld [vmem:[#allocation8_spill] sm:$0xff] }
 0x10f   : > { %v1217_v33 = vadd.f32 0.0036580483, %v1216_v13  ;;  %vm1271_vm6 = vcmask 261120   ;;  %v1257_v26 = vadd.f32 1.0, %v1541_v61  ;;  %v1228_v6 = vadd.f32 0.014752088, %v1227_v48 }
 0x110   : > { %v1032_v25 = vadd.f32 0.4994258, %v1031_v36  ;;  %v1260_v28 = vmul.f32 %v1252_v17, %v916_v47  ;;  %v1537_v44 = vclamps-f32 %v1009_v49, 1.0  ;;  %v1542_v22 = vclamps-f32 %v1209_v63, 1.0  ;;  %v2597_v48 = vld [vmem:[#allocation6_spill] sm:$0xff] }
 0x111   : > { %v1019_v45 = vadd.f32 0.05243302, %v1018_v32  ;;  %v1265_v52 = vmul.f32 %v1257_v26, %v921_v3  ;;  %v1229_v14 = vmul.f32 %v1228_v6, %v2320_v56  ;;  %v892_v57 = vadd.f32 %v2338_v29, %v873_v53 }
 0x112   : > { %v1033_v58 = vmul.f32 %v1032_v25, %v2356_v31  ;;  %1544 = vmatmul.msk.f32.vlgmr.msra.gmra.mxu1 %vm1271_vm6, %v1260_v28  ;;  %v1218_v19 = vmul.f32 %v1217_v33, %v2320_v56  ;;  %v723_v42 = vadd.f32 %v2592_v55, %v2145_v1  ;;  %v1253_v50 = vadd.f32 1.0, %v1537_v44 }
 0x113   : > { %1549 = vmatmul.msk.f32.vlgmr.msra.gmra.mxu3 %vm1271_vm6, %v1265_v52  ;;  %v1230_v46 = vadd.f32 0.112945676, %v1229_v14  ;;  %v2435_v9 = vadd.f32 %v903_v18, %v892_v57  ;;  %v1020_v37 = vmul.f32 %v1019_v45, %v2356_v31  ;;  %v1258_v59 = vadd.f32 1.0, %v1542_v22  ;;  %v2596_v18 = vld [vmem:[#allocation3_spill] sm:$0xff] }
 0x114   : > { %v1034_v30 = vadd.f32 1.0, %v1033_v58  ;;  %v742_v54 = vadd.f32 %v2593_v60, %v723_v42  ;;  %v917_v29 = vmul.f32 0.5, %v2214_v8  ;;  %v1219_v40 = vadd.f32 0.05243302, %v1218_v19 }
 0x115   : > { %v1231_v10 = vmul.f32 %v1230_v46, %v2320_v56  ;;  %v2442_v1 = vmul.f32 0.70710677, %v2435_v9  ;;  %v922_v51 = vmul.f32 0.5, %v2198_v12  ;;  %v1021_v43 = vadd.f32 0.18741608, %v1020_v37 }
 0x116   : > { %1628 = vrcp.f32 %v1034_v30  ;;  %v761_v11 = vadd.f32 %v2594_v24, %v742_v54  ;;  %v1261_v16 = vmul.f32 %v1253_v50, %v917_v29  ;;  %v1220_v8 = vmul.f32 %v1219_v40, %v2320_v56 }
 0x117   : > { %v1232_v34 = vadd.f32 0.4994258, %v1231_v10  ;;  %v1052_v2 = vmul.f32 %v2442_v1, %v2442_v1  ;;  %v1266_v13 = vmul.f32 %v1258_v59, %v922_v51  ;;  %v1022_v49 = vmul.f32 %v1021_v43, %v2356_v31 }
 0x118   : > { %v780_v23 = vadd.f32 %v2595_v27, %v761_v11  ;;  %v866_v47 = vmul.f32 %v1953_v15, %v2189_v4  ;;  %v1221_v3 = vadd.f32 0.18741608, %v1220_v8  ;;  %v1046_v33 = vand.u32 2147483648, %v1034_v30 }
 0x119   : > { %v1233_v21 = vmul.f32 %v1232_v34, %v2320_v56  ;;  %v2452_v38 = vmin.f32 %v1052_v2, 16.0  ;;  %v1023_v6 = vadd.f32 1.1283791, %v1022_v49  ;;  %v1044_v44 = vand.u32 2147483647, %v1034_v30 }
 0x11a   : > { %1545 = vmatmul.msk.f32.gmra.mxu1 %vm1271_vm6, %v1261_v16  ;;  %v799_v39 = vadd.f32 %v2596_v18, %v780_v23  ;;  %v904_v15 = vmul.f32 %v2176_v41, %v2114_v35  ;;  %vm1040_vm8 = vweird.f32 %v1034_v30  ;;  %v1047_v58 = vor.u32 1.1754944e-38, %v1046_v33 }
 0x11b   : > { %1550 = vmatmul.msk.f32.gmra.mxu3 %vm1271_vm6, %v1266_v13  ;;  %v2457_v32 = vadd.f32 1.0, %v1233_v21  ;;  %v1054_v61 = vmul.f32 2.1237322e-06, %v2452_v38  ;;  %v1065_v36 = vmul.f32 3.8918573e-05, %v2452_v38  ;;  %v1024_v42 = vmul.f32 %v1023_v6, %v2311_v5 }
 0x11c   : > { %v1629_v12 = vpop.eup %1628  ;;  %v818_v53 = vadd.f32 %v2597_v48, %v799_v39  ;;  %vm1045_vm10 = vcmp.eq.f32.partialorder %v1044_v44, 8.507059e+37  ;;  %v1222_v37 = vmul.f32 %v1221_v3, %v2320_v56  ;;  %v918_v24 = vmul.f32 0.5, %v2291_v20 }
 0x11d   : > { %v1036_v63 = vmul.f32 %v1629_v12, %v1034_v30  ;;  %1630 = vrcp.f32 %v2457_v32  ;;  %v1055_v26 = vadd.f32 0.00028619796, %v1054_v61  ;;  %v1066_v25 = vadd.f32 0.001143296, %v1065_v36 }
 0x11e   : > { %v874_v31 = vadd.f32 %v866_v47, %v818_v53  ;;  %vm1041_vm7 = vweird.f32 %v1629_v12  ;;  %v1246_v54 = vand.u32 2147483648, %v2457_v32  ;;  %v1223_v10 = vadd.f32 1.1283791, %v1222_v37 }
 0x11f   : > { %v1037_v17 = vsub.f32 1.0, %v1036_v63  ;;  %v1056_v22 = vmul.f32 %v1055_v26, %v2452_v38  ;;  %v1067_v45 = vmul.f32 %v1066_v25, %v2452_v38  ;;  %vm1042_vm9 = vmor %vm1040_vm8, %vm1041_vm7  ;;  %v1244_v51 = vand.u32 2147483647, %v2457_v32 }
 0x120   : > { %v893_v52 = vadd.f32 %v2222_v7, %v874_v31  ;;  %vm1240_vm12 = vweird.f32 %v2457_v32  ;;  %v1247_v2 = vor.u32 1.1754944e-38, %v1246_v54 }
 0x121   : > { %v1038_v28 = vmul.f32 %v1629_v12, %v1037_v17  ;;  %v1057_v14 = vadd.f32 0.0036580483, %v1056_v22  ;;  %v1068_v57 = vadd.f32 0.014752088, %v1067_v45  ;;  %vm1245_vm14 = vcmp.eq.f32.partialorder %v1244_v51, 8.507059e+37 }
 0x122   : > { %v2470_v19 = vadd.f32 %v904_v15, %v893_v52 }
 0x123   : > { %v1039_v4 = vadd.f32 %v1629_v12, %v1038_v28  ;;  %v1631_v55 = vpop.eup %1630  ;;  %v1069_v35 = vmul.f32 %v1068_v57, %v2452_v38  ;;  %v1058_v59 = vmul.f32 %v1057_v14, %v2452_v38 }
 0x124   : > { %v1236_v7 = vmul.f32 %v1631_v55, %v2457_v32  ;;  %v2477_v41 = vmul.f32 0.70710677, %v2470_v19  ;;  %vm1241_vm11 = vweird.f32 %v1631_v55 }
 0x125   : > { %v1043_v46 = vsel %vm1042_vm9, %v1629_v12, %v1039_v4  ;;  %v1070_v5 = vadd.f32 0.112945676, %v1069_v35  ;;  %v1059_v13 = vadd.f32 0.05243302, %v1058_v59  ;;  %vm1242_vm13 = vmor %vm1240_vm12, %vm1241_vm11  ;;  %v1224_v12 = vmul.f32 %v1223_v10, %v2254_v0 }
 0x126   : > { %v1048_v50 = vsel %vm1045_vm10, %v1047_v58, %v1043_v46  ;;  %v1237_v30 = vsub.f32 1.0, %v1236_v7  ;;  %v1092_v40 = vmul.f32 %v2477_v41, %v2477_v41  ;;  %v923_v0 = vmul.f32 0.5, %v2229_v62 }
 0x127   : > { %v1049_v60 = vmul.f32 %v1048_v50, %v1024_v42  ;;  %v1071_v16 = vmul.f32 %v1070_v5, %v2452_v38  ;;  %v1060_v61 = vmul.f32 %v1059_v13, %v2452_v38  ;;  %v919_v5 = vmul.f32 0.5, %v2435_v9 }
 0x128   : > { %v1238_v56 = vmul.f32 %v1631_v55, %v1237_v30  ;;  %v2486_v43 = vmin.f32 %v1092_v40, 16.0 }
 0x129   : > { %v1538_v29 = vclamps-f32 %v1049_v60, 1.0  ;;  %v1072_v23 = vadd.f32 0.4994258, %v1071_v16  ;;  %v1061_v33 = vadd.f32 0.18741608, %v1060_v61 }
 0x12a   : > { %v1239_v34 = vadd.f32 %v1631_v55, %v1238_v56  ;;  %v1094_v8 = vmul.f32 2.1237322e-06, %v2486_v43  ;;  %v1105_v21 = vmul.f32 3.8918573e-05, %v2486_v43 }
 0x12b   : > { %v1254_v11 = vadd.f32 1.0, %v1538_v29  ;;  %v1073_v39 = vmul.f32 %v1072_v23, %v2452_v38  ;;  %v1062_v44 = vmul.f32 %v1061_v33, %v2452_v38 }
 0x12c   : > { %v1243_v20 = vsel %vm1242_vm13, %v1631_v55, %v1239_v34  ;;  %v1095_v49 = vadd.f32 0.00028619796, %v1094_v8  ;;  %v1106_v63 = vadd.f32 0.001143296, %v1105_v21  ;;  %v920_v21 = vmul.f32 0.5, %v2470_v19 }
 0x12d   : > { %v1262_v27 = vmul.f32 %v1254_v11, %v918_v24  ;;  %v1248_v18 = vsel %vm1245_vm14, %v1247_v2, %v1243_v20  ;;  %v1074_v36 = vadd.f32 1.0, %v1073_v39  ;;  %v1063_v4 = vadd.f32 1.1283791, %v1062_v44 }
 0x12e   : > { %v1249_v32 = vmul.f32 %v1248_v18, %v1224_v12  ;;  %v1096_v48 = vmul.f32 %v1095_v49, %v2486_v43  ;;  %v1107_v53 = vmul.f32 %v1106_v63, %v2486_v43  ;;  %v1619_v18 = vld [vmem:[%s2551_s8] ss:$0 sm:$0xff] }
 0x12f   : > { %1546 = vmatmul.msk.f32.gmra.mxu1 %vm1271_vm6, %v1262_v27  ;;  %1632 = vrcp.f32 %v1074_v36  ;;  %v1086_v58 = vand.u32 2147483648, %v1074_v36  ;;  %v1084_v55 = vand.u32 2147483647, %v1074_v36  ;;  %vm1080_vm1 = vweird.f32 %v1074_v36 }
 0x130   : > { %v1543_v47 = vclamps-f32 %v1249_v32, 1.0  ;;  %v1108_v3 = vadd.f32 0.014752088, %v1107_v53  ;;  %v1097_v26 = vadd.f32 0.0036580483, %v1096_v48  ;;  %v1064_v7 = vmul.f32 %v1063_v4, %v2442_v1 }
 0x131   : > { %v1087_v38 = vor.u32 1.1754944e-38, %v1086_v58  ;;  %vm1085_vm3 = vcmp.eq.f32.partialorder %v1084_v55, 8.507059e+37 }
 0x132   : > { %v1259_v17 = vadd.f32 1.0, %v1543_v47  ;;  %v1109_v31 = vmul.f32 %v1108_v3, %v2486_v43  ;;  %v1098_v22 = vmul.f32 %v1097_v26, %v2486_v43 }
 0x134   : > { %v1267_v25 = vmul.f32 %v1259_v17, %v923_v0  ;;  %v1110_v6 = vadd.f32 0.112945676, %v1109_v31  ;;  %v1099_v14 = vadd.f32 0.05243302, %v1098_v22 }
 0x135   : > { %v1633_v28 = vpop.eup %1632 }
 0x136   : > { %1551 = vmatmul.msk.f32.gmra.mxu3 %vm1271_vm6, %v1267_v25  ;;  %v1076_v45 = vmul.f32 %v1633_v28, %v1074_v36  ;;  %v1111_v52 = vmul.f32 %v1110_v6, %v2486_v43  ;;  %vm1081_vm15 = vweird.f32 %v1633_v28  ;;  %v1100_v37 = vmul.f32 %v1099_v14, %v2486_v43 }
 0x137   : > { %vm1082_vm2 = vmor %vm1080_vm1, %vm1081_vm15 }
 0x138   : > { %v1077_v15 = vsub.f32 1.0, %v1076_v45  ;;  %v1112_v62 = vadd.f32 0.4994258, %v1111_v52  ;;  %v1101_v54 = vadd.f32 0.18741608, %v1100_v37 }
 0x13a   : > { %v1078_v57 = vmul.f32 %v1633_v28, %v1077_v15  ;;  %v1113_v42 = vmul.f32 %v1112_v62, %v2486_v43  ;;  %v1102_v10 = vmul.f32 %v1101_v54, %v2486_v43 }
 0x13c   : > { %v1079_v46 = vadd.f32 %v1633_v28, %v1078_v57  ;;  %v1114_v50 = vadd.f32 1.0, %v1113_v42  ;;  %v1103_v1 = vadd.f32 1.1283791, %v1102_v10 }
 0x13e   : > { %v1083_v60 = vsel %vm1082_vm2, %v1633_v28, %v1079_v46  ;;  %1634 = vrcp.f32 %v1114_v50  ;;  %v1126_v11 = vand.u32 2147483648, %v1114_v50  ;;  %v1124_v34 = vand.u32 2147483647, %v1114_v50 }
 0x13f   : > { %v1088_v35 = vsel %vm1085_vm3, %v1087_v38, %v1083_v60  ;;  %vm1120_vm5 = vweird.f32 %v1114_v50  ;;  %v1104_v9 = vmul.f32 %v1103_v1, %v2477_v41 }
 0x140   : > { %v1089_v30 = vmul.f32 %v1088_v35, %v1064_v7  ;;  %v1127_v13 = vor.u32 1.1754944e-38, %v1126_v11  ;;  %vm1125_vm8 = vcmp.eq.f32.partialorder %v1124_v34, 8.507059e+37 }
 0x142   : > { %v1539_v59 = vclamps-f32 %v1089_v30, 1.0 }
 0x144   : > { %v1635_v29 = vpop.eup %1634  ;;  %v1255_v40 = vadd.f32 1.0, %v1539_v59 }
 0x145   : > { %v1116_v56 = vmul.f32 %v1635_v29, %v1114_v50  ;;  %vm1121_vm4 = vweird.f32 %v1635_v29 }
 0x146   : > { %v1263_v51 = vmul.f32 %v1255_v40, %v919_v5  ;;  %vm1122_vm7 = vmor %vm1120_vm5, %vm1121_vm4 }
 0x147   : > { %v1117_v24 = vsub.f32 1.0, %v1116_v56 }
 0x148   : > { %1547 = vmatmul.msk.f32.gmra.mxu1 %vm1271_vm6, %v1263_v51 }
 0x149   : > { %v1118_v16 = vmul.f32 %v1635_v29, %v1117_v24 }
 0x14b   : > { %v1119_v2 = vadd.f32 %v1635_v29, %v1118_v16 }
 0x14d   : > { %v1123_v27 = vsel %vm1122_vm7, %v1635_v29, %v1119_v2 }
 0x14e   : > { %v1128_v43 = vsel %vm1125_vm8, %v1127_v13, %v1123_v27 }
 0x14f   : > { %v1129_v23 = vmul.f32 %v1128_v43, %v1104_v9 }
 0x151   : > { %v1540_v8 = vclamps-f32 %v1129_v23, 1.0 }
 0x153   : > { %v1256_v12 = vadd.f32 1.0, %v1540_v8 }
 0x155   : > { %v1264_v20 = vmul.f32 %v1256_v12, %v920_v21 }
 0x157   : > { %1548 = vmatmul.msk.f32.gmra.mxu1 %vm1271_vm6, %v1264_v20 }
 0x18f   : > { %v1313_v41 = vpop.f32.mrf.mxu1 }
 0x190   : > { %v1314_v39 = vadd.f32 %v1619_v18, %v1313_v41 }
 0x192   : > { %1337 = vst.msk [vmem:[%s499_s26] sm:$0xff] %vm540_vm0, %v1314_v39 }
 0x196   : > { %v1328_v49 = vpop.f32.mrf.mxu3 }
 0x197   : > { %v1316_v63 = vpop.f32.mrf.mxu1  ;;  %v1329_v19 = vadd.f32 %v1619_v18, %v1328_v49 }
 0x198   : > { %v1317_v32 = vadd.f32 %v1619_v18, %v1316_v63 }
 0x199   : > { %1342 = vst.msk [vmem:[%s499_s26 + $0x28] sm:$0xff] %vm540_vm0, %v1329_v19 }
 0x19a   : > { %1338 = vst.msk [vmem:[%s499_s26 + $0x8] sm:$0xff] %vm540_vm0, %v1317_v32 }
 0x19e   : > { %v1331_v61 = vpop.f32.mrf.mxu3 }
 0x19f   : > { %v1332_v36 = vadd.f32 %v1619_v18, %v1331_v61 }
 0x1a1   : > { %1343 = vst.msk [vmem:[%s499_s26 + $0x30] sm:$0xff] %vm540_vm0, %v1332_v36 }
 0x1ac   : > { %v1319_v48 = vpop.f32.mrf.mxu1 }
 0x1ad   : > { %v1320_v53 = vadd.f32 %v1619_v18, %v1319_v48 }
 0x1af   : > { %1339 = vst.msk [vmem:[%s499_s26 + $0x10] sm:$0xff] %vm540_vm0, %v1320_v53 }
 0x1b9   : > { %v1334_v47 = vpop.f32.mrf.mxu3 }
 0x1ba   : > { %v1335_v0 = vadd.f32 %v1619_v18, %v1334_v47 }
 0x1bc   : > { %1344 = vst.msk [vmem:[%s499_s26 + $0x38] sm:$0xff] %vm540_vm0, %v1335_v0 }
 0x1c5   : > { %v1322_v17 = vpop.f32.mrf.mxu1 }
 0x1c6   : > { %v1323_v3 = vadd.f32 %v1619_v18, %v1322_v17 }
 0x1c8   : > { %1340 = vst.msk [vmem:[%s499_s26 + $0x18] sm:$0xff] %vm540_vm0, %v1323_v3 }
 0x1d4   : > { %v1325_v33 = vpop.f32.mrf.mxu1 }
 0x1d5   : > { %v1326_v26 = vadd.f32 %v1619_v18, %v1325_v33 }
 0x1d7   : > { %1341 = vst.msk [vmem:[%s499_s26 + $0x20] sm:$0xff] %vm540_vm0, %v1326_v26 }
 0x1d8 PF: > { %s19_s13 = sadd.s32 1, %s1674_s13   ;;  %s2598_s30 = smov %s1666_s11 }
 0x1d9   : > { %p16_p12 = scmp.ge.s32.totalorder %s19_s13, 10   ;;  %s2599_s10 = smov %s1670_s12 }
 0x1da   : > { %s2600_s11 = smov %s2603_s14  ;;  %s2601_s12 = smov %s2607_s15 }
 0x1db   :  { %18 = sbr.rel (!%p16_p12) target bundleno = 3 (0x3), region = 92 }

</bundles_post_ra>
